<compile_context>
chip_gen: v6e
topology: v6e:2x2x1
jax: 0.10.0
libtpu: 0.0.40
codegen_flags: <defaults>
</compile_context>

<pallas_src>
import functools

import jax
import jax.numpy as jnp
import numpy as np
from jax import lax
from jax.experimental import pallas as pl
from jax.experimental.pallas import tpu as pltpu

KSIZE = 3   # kernel_size=3
PAD = 1     # padding=1 ("SAME")


def _round_up(n, m):
    return ((n + m - 1) // m) * m


def _build_tap_masks(H, W):
    """0/1 masks (one per 3x3 tap) implementing SAME zero padding, (9, 1, H*W) f32."""
    y = np.arange(H).reshape(H, 1)
    x = np.arange(W).reshape(1, W)
    masks = np.ones((KSIZE * KSIZE, 1, H * W), np.float32)
    for dy in range(KSIZE):
        for dx in range(KSIZE):
            valid = np.ones((H, W), np.bool_)
            if dy == 0:
                valid &= (y >= 1)
            if dy == KSIZE - 1:
                valid &= (y <= H - 2)
            if dx == 0:
                valid &= (x >= 1)
            if dx == KSIZE - 1:
                valid &= (x <= W - 2)
            masks[dy * KSIZE + dx, 0, :] = valid.reshape(-1).astype(np.float32)
    return jnp.asarray(masks)


def convlstm_seq_kernel(x_ref, mask_ref, w_ref, y_ref,
                        rhs_ref, acc_ref, h_ref, c_ref, *,
                        H, W, CH, CXP, K_RAW, K_PAD):
    """One grid step = one (batch, timestep) pair; T is the inner carry axis.

    x_ref    : (1, 1, CXP, H*W)  frame t (channels zero-padded to CXP), compute dtype
    mask_ref : (9, 1, H*W)       per-tap 0/1 boundary masks (SAME padding), f32
    w_ref    : (4*CH, K_PAD)     tap-folded conv weight + bias column, compute dtype
    y_ref    : (1, 1, CH, H*W)   hidden-state output for (b, t), f32
    rhs_ref  : VMEM (K_PAD, H*W) folded conv patch matrix, compute dtype
    acc_ref  : VMEM (4*CH, H*W)  f32 pre-activations
    h_ref    : VMEM (CH, H*W)    f32 hidden state, carried across T
    c_ref    : VMEM (CH, H*W)    f32 cell state, carried across T
    """
    HW = H * W
    t = pl.program_id(1)

    @pl.when(t == 0)
    def _():
        # Fresh zero state for this batch element.  Also (re)write the constant
        # bias rows of the patch matrix: row K_RAW = 1 (bias), the remaining
        # alignment-padding rows = 0 so uninitialised VMEM never reaches the MXU.
        h_ref[...] = jnp.zeros_like(h_ref)
        c_ref[...] = jnp.zeros_like(c_ref)
        nb = K_PAD - K_RAW
        row_id = lax.broadcasted_iota(jnp.int32, (nb, HW), 0)
        rhs_ref[K_RAW:K_PAD, :] = jnp.where(
            row_id == 0, jnp.float32(1.0), jnp.float32(0.0)).astype(rhs_ref.dtype)

    h32 = h_ref[...]                              # (CH,  HW) f32
    x32 = x_ref[0, 0].astype(jnp.float32)         # (CXP, HW) f32

    # Build the folded patch matrix.  For tap (dy, dx) the conv reads flat
    # position m + s with s = (dy-1)*W + (dx-1); pltpu.roll (XLU lane rotate,
    # jnp.roll semantics, shift = (-s) % HW) brings that element to column m,
    # and the precomputed 0/1 mask zeroes the wrapped / out-of-bounds columns.
    # Row layout (all 8-aligned): 9 h-taps, then 9 x-taps, then bias rows.
    x_base = KSIZE * KSIZE * CH
    dt = rhs_ref.dtype
    for dy in range(KSIZE):
        for dx in range(KSIZE):
            tap = dy * KSIZE + dx
            s = (dy - PAD) * W + (dx - PAD)
            if s == 0:
                rh, rx = h32, x32
            else:
                rh = pltpu.roll(h32, (-s) % HW, axis=1)
                rx = pltpu.roll(x32, (-s) % HW, axis=1)
            if tap == (KSIZE * KSIZE) // 2:       # centre tap: mask is all-ones
                rhs_ref[tap * CH:(tap + 1) * CH, :] = rh.astype(dt)
                rhs_ref[x_base + tap * CXP:
                        x_base + (tap + 1) * CXP, :] = rx.astype(dt)
            else:
                m = mask_ref[tap]                 # (1, HW) 0/1, read once per tap
                rhs_ref[tap * CH:(tap + 1) * CH, :] = (rh * m).astype(dt)
                rhs_ref[x_base + tap * CXP:
                        x_base + (tap + 1) * CXP, :] = (rx * m).astype(dt)

    # Whole 3x3 convolution + bias = ONE MXU matmul, f32 accumulate:
    #   (4*CH, K_PAD) @ (K_PAD, H*W) -> (4*CH, H*W)
    acc_ref[...] = jnp.dot(w_ref[...], rhs_ref[...],
                           preferred_element_type=jnp.float32)

    # LSTM gating (torch.split order: i, f, o, g), chunked over 8-row sublane
    # blocks to bound vreg pressure.  sigmoid(v) = 0.5*tanh(0.5*v) + 0.5 keeps
    # the EUP to one push per vreg.  All gating math stays f32.
    def sigm(v):
        return 0.5 * jnp.tanh(0.5 * v) + 0.5

    R = 8
    for r in range(0, CH, R):
        i = sigm(acc_ref[0 * CH + r:0 * CH + r + R, :])
        f = sigm(acc_ref[1 * CH + r:1 * CH + r + R, :])
        o = sigm(acc_ref[2 * CH + r:2 * CH + r + R, :])
        g = jnp.tanh(acc_ref[3 * CH + r:3 * CH + r + R, :])
        c_next = f * c_ref[r:r + R, :] + i * g
        h_next = o * jnp.tanh(c_next)
        c_ref[r:r + R, :] = c_next
        h_ref[r:r + R, :] = h_next
        y_ref[0, 0, r:r + R, :] = h_next.astype(y_ref.dtype)


def conv_lstm_forward(x_seq, w_oihw, bias, *, hidden_dim,
                      return_sequences=True, compute_dtype=jnp.bfloat16):
    """ConvLSTM.forward (num_layers=1, batch_first=True, zero initial state).

    x_seq : (B, T, C_in, H, W) PyTorch-layout frames
    w_oihw: (4*hidden, C_in + hidden, 3, 3) combined conv weight ([x, h] channels)
    bias  : (4*hidden,)
    """
    B, T, C_x, H, W = x_seq.shape
    CH = hidden_dim
    assert CH % 8 == 0, "hidden_dim must be a multiple of 8 for this kernel"
    HW = H * W
    assert HW % 128 == 0, "H*W must be a multiple of 128 for lane-dense tiles"
    CXP = _round_up(C_x, 8)
    K_RAW = KSIZE * KSIZE * (CH + CXP)
    K_PAD = _round_up(K_RAW + 1, 8)        # +1 ones-row for the folded bias

    # Channel-pad x once for the whole sequence and flatten spatial (free
    # reshape) — the kernel consumes flattened NCHW directly, no transposes.
    if CXP != C_x:
        x_p = jnp.pad(x_seq, ((0, 0), (0, 0), (0, CXP - C_x), (0, 0), (0, 0)))
    else:
        x_p = x_seq
    x_flat = x_p.reshape(B, T, CXP, HW).astype(compute_dtype)

    # Fold the 3x3 conv weight to (4*CH, K_PAD): 9 h-taps (dy-major), 9 x-taps,
    # bias column, zero alignment columns — matches the kernel's rhs row order.
    w_h = jnp.transpose(w_oihw[:, C_x:, :, :], (0, 2, 3, 1)).reshape(4 * CH, 9 * CH)
    w_x = jnp.pad(w_oihw[:, :C_x, :, :], ((0, 0), (0, CXP - C_x), (0, 0), (0, 0)))
    w_x = jnp.transpose(w_x, (0, 2, 3, 1)).reshape(4 * CH, 9 * CXP)
    w_folded = jnp.concatenate(
        [w_h, w_x, bias.reshape(4 * CH, 1),
         jnp.zeros((4 * CH, K_PAD - K_RAW - 1), w_oihw.dtype)],
        axis=1).astype(compute_dtype)

    masks = _build_tap_masks(H, W)

    kernel = functools.partial(convlstm_seq_kernel, H=H, W=W, CH=CH, CXP=CXP,
                               K_RAW=K_RAW, K_PAD=K_PAD)

    cdt_bytes = jnp.dtype(compute_dtype).itemsize
    flops = 2 * B * T * 4 * CH * K_PAD * HW
    bytes_accessed = (B * T * CXP * HW * cdt_bytes      # x in
                      + B * T * CH * HW * 4             # h sequence out
                      + 4 * CH * K_PAD * cdt_bytes      # folded weight
                      + KSIZE * KSIZE * HW * 4)         # masks

    y = pl.pallas_call(
        kernel,
        out_shape=jax.ShapeDtypeStruct((B, T, CH, HW), x_seq.dtype),
        grid_spec=pltpu.PrefetchScalarGridSpec(
            num_scalar_prefetch=0,
            grid=(B, T),    # B outer "parallel" (v7x megacore), T inner carry axis
            in_specs=[
                pl.BlockSpec((1, 1, CXP, HW), lambda b, t: (b, t, 0, 0)),
                pl.BlockSpec((KSIZE * KSIZE, 1, HW), lambda b, t: (0, 0, 0)),
                pl.BlockSpec((4 * CH, K_PAD), lambda b, t: (0, 0)),
            ],
            out_specs=pl.BlockSpec((1, 1, CH, HW), lambda b, t: (b, t, 0, 0)),
            scratch_shapes=[
                pltpu.VMEM((K_PAD, HW), compute_dtype),   # folded patch matrix
                pltpu.VMEM((4 * CH, HW), jnp.float32),    # f32 pre-activations
                pltpu.VMEM((CH, HW), jnp.float32),        # carried hidden state
                pltpu.VMEM((CH, HW), jnp.float32),        # carried cell state
            ],
        ),
        compiler_params=pltpu.CompilerParams(
            dimension_semantics=("parallel", "arbitrary"),
            vmem_limit_bytes=32 * 1024 * 1024,
        ),
        cost_estimate=pl.CostEstimate(
            flops=flops,
            transcendentals=5 * B * T * CH * HW,
            bytes_accessed=bytes_accessed,
        ),
    )(x_flat, masks, w_folded)

    y = y.reshape(B, T, CH, H, W)
    return y if return_sequences else y[:, -1]


def conv_lstm_ref(x_seq, w_oihw, bias, hidden_dim):
    """Pure-JAX reference mirroring the PyTorch ConvLSTM forward (NCHW)."""
    B, T, C_x, H, W = x_seq.shape
    h = jnp.zeros((B, hidden_dim, H, W), x_seq.dtype)
    c = jnp.zeros((B, hidden_dim, H, W), x_seq.dtype)
    outs = []
    for t in range(T):
        combined = jnp.concatenate([x_seq[:, t], h], axis=1)
        conv = lax.conv_general_dilated(
            combined, w_oihw, window_strides=(1, 1), padding="SAME",
            dimension_numbers=("NCHW", "OIHW", "NCHW"),
            precision=lax.Precision.HIGHEST)
        conv = conv + bias.reshape(1, -1, 1, 1)
        cc_i, cc_f, cc_o, cc_g = jnp.split(conv, 4, axis=1)
        i = jax.nn.sigmoid(cc_i)
        f = jax.nn.sigmoid(cc_f)
        o = jax.nn.sigmoid(cc_o)
        g = jnp.tanh(cc_g)
        c = f * c + i * g
        h = o * jnp.tanh(c)
        outs.append(h[:, None])
    return jnp.concatenate(outs, axis=1)


if __name__ == "__main__":
    # ConvLSTM(input_dim=4, hidden_dim=32, kernel_size=3, num_layers=1,
    #          batch_first=True, return_sequences=True) on (B,T,C,H,W)=(2,8,4,16,16).
    B, T, C_x, CH, H, W = 2, 8, 4, 32, 16, 16

    key = jax.random.PRNGKey(0)
    kx, kw, kb = jax.random.split(key, 3)
    x_seq = jax.random.normal(kx, (B, T, C_x, H, W), jnp.float32)
    # nn.Conv2d(C_x + CH, 4*CH, 3, padding=1, bias=True) parameters (OIHW).
    w = 0.1 * jax.random.normal(kw, (4 * CH, C_x + CH, KSIZE, KSIZE), jnp.float32)
    b = 0.1 * jax.random.normal(kb, (4 * CH,), jnp.float32)

    ref = conv_lstm_ref(x_seq, w, b, CH)

    # f32 matmul-operand path: tight check against the f32 reference.
    fwd_f32 = jax.jit(functools.partial(conv_lstm_forward, hidden_dim=CH,
                                        compute_dtype=jnp.float32))
    out_f32 = fwd_f32(x_seq, w, b)
    jax.block_until_ready(out_f32)
    np.testing.assert_allclose(np.asarray(out_f32), np.asarray(ref),
                               rtol=2e-3, atol=2e-3)

    # bf16 matmul-operand path (production default): f32 accumulate, f32 gating
    # and f32 carried h/c, so only MXU-operand rounding differs from the ref.
    fwd_bf16 = jax.jit(functools.partial(conv_lstm_forward, hidden_dim=CH))
    out_bf16 = fwd_bf16(x_seq, w, b)
    jax.block_until_ready(out_bf16)
    np.testing.assert_allclose(np.asarray(out_bf16), np.asarray(ref),
                               rtol=3e-2, atol=3e-2)

    print("KERNEL_OK")
</pallas_src>

<mosaic_0001>
module attributes {stable_mosaic.version = 11 : i64} {
  func.func @convlstm_seq_kernel(%arg0: i32, %arg1: i32, %arg2: memref<1x1x8x256xf32, #tpu.memory_space<vmem>>, %arg3: memref<9x1x256xf32, #tpu.memory_space<vmem>>, %arg4: memref<128x368xf32, #tpu.memory_space<vmem>>, %arg5: memref<1x1x32x256xf32, #tpu.memory_space<vmem>>, %arg6: memref<368x256xf32, #tpu.memory_space<vmem>>, %arg7: memref<128x256xf32, #tpu.memory_space<vmem>>, %arg8: memref<32x256xf32, #tpu.memory_space<vmem>>, %arg9: memref<32x256xf32, #tpu.memory_space<vmem>>) attributes {dimension_semantics = [#tpu.dimension_semantics<parallel>, #tpu.dimension_semantics<arbitrary>], iteration_bounds = array<i64: 2, 8>, scalar_prefetch = 0 : i64, scratch_operands = 4 : i64, tpu.core_type = #tpu.core_type<tc>, window_params = [{transform_indices = @transform_0, window_bounds = array<i64: 1, 1, 8, 256>}, {pipeline_mode = #tpu.pipeline_mode<synchronous>, transform_indices = @transform_1, window_bounds = array<i64: 9, 1, 256>}, {pipeline_mode = #tpu.pipeline_mode<synchronous>, transform_indices = @transform_2, window_bounds = array<i64: 128, 368>}, {transform_indices = @transform_3, window_bounds = array<i64: 1, 1, 32, 256>}]} {
    %c0_i32 = arith.constant 0 : i32
    %0 = arith.cmpi eq, %arg1, %c0_i32 : i32
    %1 = arith.extui %0 : i1 to i32
    %c0_i32_0 = arith.constant 0 : i32
    %2 = arith.cmpi ne, %1, %c0_i32_0 : i32
    scf.if %2 {
      %cst_153 = arith.constant 0.000000e+00 : f32
      %240 = vector.broadcast %cst_153 : f32 to vector<32x256xf32>
      %c0_154 = arith.constant 0 : index
      %c0_155 = arith.constant 0 : index
      %241 = vector.load %arg8[%c0_154, %c0_155] : memref<32x256xf32, #tpu.memory_space<vmem>>, vector<32x256xf32>
      tpu.vector_store %arg8[%c0_154, %c0_155], %240 {strides = array<i32>} : memref<32x256xf32, #tpu.memory_space<vmem>>, vector<32x256xf32>,
      %cst_156 = arith.constant 0.000000e+00 : f32
      %242 = vector.broadcast %cst_156 : f32 to vector<32x256xf32>
      %c0_157 = arith.constant 0 : index
      %c0_158 = arith.constant 0 : index
      %243 = vector.load %arg9[%c0_157, %c0_158] : memref<32x256xf32, #tpu.memory_space<vmem>>, vector<32x256xf32>
      tpu.vector_store %arg9[%c0_157, %c0_158], %242 {strides = array<i32>} : memref<32x256xf32, #tpu.memory_space<vmem>>, vector<32x256xf32>,
      %244 = tpu.iota {dimensions = array<i32: 0>} : vector<8x256xi32>
      %c0_i32_159 = arith.constant 0 : i32
      %245 = vector.broadcast %c0_i32_159 : i32 to vector<8x256xi32>
      %246 = arith.cmpi eq, %244, %245 : vector<8x256xi32>
      %cst_160 = arith.constant 1.000000e+00 : f32
      %cst_161 = arith.constant 0.000000e+00 : f32
      %247 = vector.broadcast %cst_160 : f32 to vector<8x256xf32>
      %248 = vector.broadcast %cst_161 : f32 to vector<8x256xf32>
      %249 = arith.select %246, %247, %248 : vector<8x256xi1>, vector<8x256xf32>
      %c360 = arith.constant 360 : index
      %c0_162 = arith.constant 0 : index
      %250 = vector.load %arg6[%c360, %c0_162] : memref<368x256xf32, #tpu.memory_space<vmem>>, vector<8x256xf32>
      tpu.vector_store %arg6[%c360, %c0_162], %249 {strides = array<i32>} : memref<368x256xf32, #tpu.memory_space<vmem>>, vector<8x256xf32>,
    } else {
    }
    %c0 = arith.constant 0 : index
    %c0_1 = arith.constant 0 : index
    %3 = vector.load %arg8[%c0, %c0_1] : memref<32x256xf32, #tpu.memory_space<vmem>>, vector<32x256xf32>
    %c0_2 = arith.constant 0 : index
    %c0_3 = arith.constant 0 : index
    %c0_4 = arith.constant 0 : index
    %c0_5 = arith.constant 0 : index
    %4 = vector.load %arg2[%c0_2, %c0_3, %c0_4, %c0_5] : memref<1x1x8x256xf32, #tpu.memory_space<vmem>>, vector<1x1x8x256xf32>
    %5 = vector.shape_cast %4 : vector<1x1x8x256xf32> to vector<8x256xf32>
    %c17_i32 = arith.constant 17 : i32
    %6 = tpu.dynamic_rotate %3 by %c17_i32 dim 1 : vector<32x256xf32>, i32 -> vector<32x256xf32>
    %c17_i32_6 = arith.constant 17 : i32
    %7 = tpu.dynamic_rotate %5 by %c17_i32_6 dim 1 : vector<8x256xf32>, i32 -> vector<8x256xf32>
    %c0_7 = arith.constant 0 : index
    %c0_8 = arith.constant 0 : index
    %c0_9 = arith.constant 0 : index
    %8 = vector.load %arg3[%c0_7, %c0_8, %c0_9] : memref<9x1x256xf32, #tpu.memory_space<vmem>>, vector<1x1x256xf32>
    %9 = vector.shape_cast %8 : vector<1x1x256xf32> to vector<1x256xf32>
    %10 = vector.broadcast %9 : vector<1x256xf32> to vector<32x256xf32>
    %11 = arith.mulf %6, %10 : vector<32x256xf32>
    %c0_10 = arith.constant 0 : index
    %c0_11 = arith.constant 0 : index
    %12 = vector.load %arg6[%c0_10, %c0_11] : memref<368x256xf32, #tpu.memory_space<vmem>>, vector<32x256xf32>
    tpu.vector_store %arg6[%c0_10, %c0_11], %11 {strides = array<i32>} : memref<368x256xf32, #tpu.memory_space<vmem>>, vector<32x256xf32>,
    %13 = vector.broadcast %9 : vector<1x256xf32> to vector<8x256xf32>
    %14 = arith.mulf %7, %13 : vector<8x256xf32>
    %c288 = arith.constant 288 : index
    %c0_12 = arith.constant 0 : index
    %15 = vector.load %arg6[%c288, %c0_12] : memref<368x256xf32, #tpu.memory_space<vmem>>, vector<8x256xf32>
    tpu.vector_store %arg6[%c288, %c0_12], %14 {strides = array<i32>} : memref<368x256xf32, #tpu.memory_space<vmem>>, vector<8x256xf32>,
    %c16_i32 = arith.constant 16 : i32
    %16 = tpu.dynamic_rotate %3 by %c16_i32 dim 1 : vector<32x256xf32>, i32 -> vector<32x256xf32>
    %c16_i32_13 = arith.constant 16 : i32
    %17 = tpu.dynamic_rotate %5 by %c16_i32_13 dim 1 : vector<8x256xf32>, i32 -> vector<8x256xf32>
    %c1 = arith.constant 1 : index
    %c0_14 = arith.constant 0 : index
    %c0_15 = arith.constant 0 : index
    %18 = vector.load %arg3[%c1, %c0_14, %c0_15] : memref<9x1x256xf32, #tpu.memory_space<vmem>>, vector<1x1x256xf32>
    %19 = vector.shape_cast %18 : vector<1x1x256xf32> to vector<1x256xf32>
    %20 = vector.broadcast %19 : vector<1x256xf32> to vector<32x256xf32>
    %21 = arith.mulf %16, %20 : vector<32x256xf32>
    %c32 = arith.constant 32 : index
    %c0_16 = arith.constant 0 : index
    %22 = vector.load %arg6[%c32, %c0_16] : memref<368x256xf32, #tpu.memory_space<vmem>>, vector<32x256xf32>
    tpu.vector_store %arg6[%c32, %c0_16], %21 {strides = array<i32>} : memref<368x256xf32, #tpu.memory_space<vmem>>, vector<32x256xf32>,
    %23 = vector.broadcast %19 : vector<1x256xf32> to vector<8x256xf32>
    %24 = arith.mulf %17, %23 : vector<8x256xf32>
    %c296 = arith.constant 296 : index
    %c0_17 = arith.constant 0 : index
    %25 = vector.load %arg6[%c296, %c0_17] : memref<368x256xf32, #tpu.memory_space<vmem>>, vector<8x256xf32>
    tpu.vector_store %arg6[%c296, %c0_17], %24 {strides = array<i32>} : memref<368x256xf32, #tpu.memory_space<vmem>>, vector<8x256xf32>,
    %c15_i32 = arith.constant 15 : i32
    %26 = tpu.dynamic_rotate %3 by %c15_i32 dim 1 : vector<32x256xf32>, i32 -> vector<32x256xf32>
    %c15_i32_18 = arith.constant 15 : i32
    %27 = tpu.dynamic_rotate %5 by %c15_i32_18 dim 1 : vector<8x256xf32>, i32 -> vector<8x256xf32>
    %c2 = arith.constant 2 : index
    %c0_19 = arith.constant 0 : index
    %c0_20 = arith.constant 0 : index
    %28 = vector.load %arg3[%c2, %c0_19, %c0_20] : memref<9x1x256xf32, #tpu.memory_space<vmem>>, vector<1x1x256xf32>
    %29 = vector.shape_cast %28 : vector<1x1x256xf32> to vector<1x256xf32>
    %30 = vector.broadcast %29 : vector<1x256xf32> to vector<32x256xf32>
    %31 = arith.mulf %26, %30 : vector<32x256xf32>
    %c64 = arith.constant 64 : index
    %c0_21 = arith.constant 0 : index
    %32 = vector.load %arg6[%c64, %c0_21] : memref<368x256xf32, #tpu.memory_space<vmem>>, vector<32x256xf32>
    tpu.vector_store %arg6[%c64, %c0_21], %31 {strides = array<i32>} : memref<368x256xf32, #tpu.memory_space<vmem>>, vector<32x256xf32>,
    %33 = vector.broadcast %29 : vector<1x256xf32> to vector<8x256xf32>
    %34 = arith.mulf %27, %33 : vector<8x256xf32>
    %c304 = arith.constant 304 : index
    %c0_22 = arith.constant 0 : index
    %35 = vector.load %arg6[%c304, %c0_22] : memref<368x256xf32, #tpu.memory_space<vmem>>, vector<8x256xf32>
    tpu.vector_store %arg6[%c304, %c0_22], %34 {strides = array<i32>} : memref<368x256xf32, #tpu.memory_space<vmem>>, vector<8x256xf32>,
    %c1_i32 = arith.constant 1 : i32
    %36 = tpu.dynamic_rotate %3 by %c1_i32 dim 1 : vector<32x256xf32>, i32 -> vector<32x256xf32>
    %c1_i32_23 = arith.constant 1 : i32
    %37 = tpu.dynamic_rotate %5 by %c1_i32_23 dim 1 : vector<8x256xf32>, i32 -> vector<8x256xf32>
    %c3 = arith.constant 3 : index
    %c0_24 = arith.constant 0 : index
    %c0_25 = arith.constant 0 : index
    %38 = vector.load %arg3[%c3, %c0_24, %c0_25] : memref<9x1x256xf32, #tpu.memory_space<vmem>>, vector<1x1x256xf32>
    %39 = vector.shape_cast %38 : vector<1x1x256xf32> to vector<1x256xf32>
    %40 = vector.broadcast %39 : vector<1x256xf32> to vector<32x256xf32>
    %41 = arith.mulf %36, %40 : vector<32x256xf32>
    %c96 = arith.constant 96 : index
    %c0_26 = arith.constant 0 : index
    %42 = vector.load %arg6[%c96, %c0_26] : memref<368x256xf32, #tpu.memory_space<vmem>>, vector<32x256xf32>
    tpu.vector_store %arg6[%c96, %c0_26], %41 {strides = array<i32>} : memref<368x256xf32, #tpu.memory_space<vmem>>, vector<32x256xf32>,
    %43 = vector.broadcast %39 : vector<1x256xf32> to vector<8x256xf32>
    %44 = arith.mulf %37, %43 : vector<8x256xf32>
    %c312 = arith.constant 312 : index
    %c0_27 = arith.constant 0 : index
    %45 = vector.load %arg6[%c312, %c0_27] : memref<368x256xf32, #tpu.memory_space<vmem>>, vector<8x256xf32>
    tpu.vector_store %arg6[%c312, %c0_27], %44 {strides = array<i32>} : memref<368x256xf32, #tpu.memory_space<vmem>>, vector<8x256xf32>,
    %c128 = arith.constant 128 : index
    %c0_28 = arith.constant 0 : index
    %46 = vector.load %arg6[%c128, %c0_28] : memref<368x256xf32, #tpu.memory_space<vmem>>, vector<32x256xf32>
    tpu.vector_store %arg6[%c128, %c0_28], %3 {strides = array<i32>} : memref<368x256xf32, #tpu.memory_space<vmem>>, vector<32x256xf32>,
    %c320 = arith.constant 320 : index
    %c0_29 = arith.constant 0 : index
    %47 = vector.load %arg6[%c320, %c0_29] : memref<368x256xf32, #tpu.memory_space<vmem>>, vector<8x256xf32>
    tpu.vector_store %arg6[%c320, %c0_29], %5 {strides = array<i32>} : memref<368x256xf32, #tpu.memory_space<vmem>>, vector<8x256xf32>,
    %c255_i32 = arith.constant 255 : i32
    %48 = tpu.dynamic_rotate %3 by %c255_i32 dim 1 : vector<32x256xf32>, i32 -> vector<32x256xf32>
    %c255_i32_30 = arith.constant 255 : i32
    %49 = tpu.dynamic_rotate %5 by %c255_i32_30 dim 1 : vector<8x256xf32>, i32 -> vector<8x256xf32>
    %c5 = arith.constant 5 : index
    %c0_31 = arith.constant 0 : index
    %c0_32 = arith.constant 0 : index
    %50 = vector.load %arg3[%c5, %c0_31, %c0_32] : memref<9x1x256xf32, #tpu.memory_space<vmem>>, vector<1x1x256xf32>
    %51 = vector.shape_cast %50 : vector<1x1x256xf32> to vector<1x256xf32>
    %52 = vector.broadcast %51 : vector<1x256xf32> to vector<32x256xf32>
    %53 = arith.mulf %48, %52 : vector<32x256xf32>
    %c160 = arith.constant 160 : index
    %c0_33 = arith.constant 0 : index
    %54 = vector.load %arg6[%c160, %c0_33] : memref<368x256xf32, #tpu.memory_space<vmem>>, vector<32x256xf32>
    tpu.vector_store %arg6[%c160, %c0_33], %53 {strides = array<i32>} : memref<368x256xf32, #tpu.memory_space<vmem>>, vector<32x256xf32>,
    %55 = vector.broadcast %51 : vector<1x256xf32> to vector<8x256xf32>
    %56 = arith.mulf %49, %55 : vector<8x256xf32>
    %c328 = arith.constant 328 : index
    %c0_34 = arith.constant 0 : index
    %57 = vector.load %arg6[%c328, %c0_34] : memref<368x256xf32, #tpu.memory_space<vmem>>, vector<8x256xf32>
    tpu.vector_store %arg6[%c328, %c0_34], %56 {strides = array<i32>} : memref<368x256xf32, #tpu.memory_space<vmem>>, vector<8x256xf32>,
    %c241_i32 = arith.constant 241 : i32
    %58 = tpu.dynamic_rotate %3 by %c241_i32 dim 1 : vector<32x256xf32>, i32 -> vector<32x256xf32>
    %c241_i32_35 = arith.constant 241 : i32
    %59 = tpu.dynamic_rotate %5 by %c241_i32_35 dim 1 : vector<8x256xf32>, i32 -> vector<8x256xf32>
    %c6 = arith.constant 6 : index
    %c0_36 = arith.constant 0 : index
    %c0_37 = arith.constant 0 : index
    %60 = vector.load %arg3[%c6, %c0_36, %c0_37] : memref<9x1x256xf32, #tpu.memory_space<vmem>>, vector<1x1x256xf32>
    %61 = vector.shape_cast %60 : vector<1x1x256xf32> to vector<1x256xf32>
    %62 = vector.broadcast %61 : vector<1x256xf32> to vector<32x256xf32>
    %63 = arith.mulf %58, %62 : vector<32x256xf32>
    %c192 = arith.constant 192 : index
    %c0_38 = arith.constant 0 : index
    %64 = vector.load %arg6[%c192, %c0_38] : memref<368x256xf32, #tpu.memory_space<vmem>>, vector<32x256xf32>
    tpu.vector_store %arg6[%c192, %c0_38], %63 {strides = array<i32>} : memref<368x256xf32, #tpu.memory_space<vmem>>, vector<32x256xf32>,
    %65 = vector.broadcast %61 : vector<1x256xf32> to vector<8x256xf32>
    %66 = arith.mulf %59, %65 : vector<8x256xf32>
    %c336 = arith.constant 336 : index
    %c0_39 = arith.constant 0 : index
    %67 = vector.load %arg6[%c336, %c0_39] : memref<368x256xf32, #tpu.memory_space<vmem>>, vector<8x256xf32>
    tpu.vector_store %arg6[%c336, %c0_39], %66 {strides = array<i32>} : memref<368x256xf32, #tpu.memory_space<vmem>>, vector<8x256xf32>,
    %c240_i32 = arith.constant 240 : i32
    %68 = tpu.dynamic_rotate %3 by %c240_i32 dim 1 : vector<32x256xf32>, i32 -> vector<32x256xf32>
    %c240_i32_40 = arith.constant 240 : i32
    %69 = tpu.dynamic_rotate %5 by %c240_i32_40 dim 1 : vector<8x256xf32>, i32 -> vector<8x256xf32>
    %c7 = arith.constant 7 : index
    %c0_41 = arith.constant 0 : index
    %c0_42 = arith.constant 0 : index
    %70 = vector.load %arg3[%c7, %c0_41, %c0_42] : memref<9x1x256xf32, #tpu.memory_space<vmem>>, vector<1x1x256xf32>
    %71 = vector.shape_cast %70 : vector<1x1x256xf32> to vector<1x256xf32>
    %72 = vector.broadcast %71 : vector<1x256xf32> to vector<32x256xf32>
    %73 = arith.mulf %68, %72 : vector<32x256xf32>
    %c224 = arith.constant 224 : index
    %c0_43 = arith.constant 0 : index
    %74 = vector.load %arg6[%c224, %c0_43] : memref<368x256xf32, #tpu.memory_space<vmem>>, vector<32x256xf32>
    tpu.vector_store %arg6[%c224, %c0_43], %73 {strides = array<i32>} : memref<368x256xf32, #tpu.memory_space<vmem>>, vector<32x256xf32>,
    %75 = vector.broadcast %71 : vector<1x256xf32> to vector<8x256xf32>
    %76 = arith.mulf %69, %75 : vector<8x256xf32>
    %c344 = arith.constant 344 : index
    %c0_44 = arith.constant 0 : index
    %77 = vector.load %arg6[%c344, %c0_44] : memref<368x256xf32, #tpu.memory_space<vmem>>, vector<8x256xf32>
    tpu.vector_store %arg6[%c344, %c0_44], %76 {strides = array<i32>} : memref<368x256xf32, #tpu.memory_space<vmem>>, vector<8x256xf32>,
    %c239_i32 = arith.constant 239 : i32
    %78 = tpu.dynamic_rotate %3 by %c239_i32 dim 1 : vector<32x256xf32>, i32 -> vector<32x256xf32>
    %c239_i32_45 = arith.constant 239 : i32
    %79 = tpu.dynamic_rotate %5 by %c239_i32_45 dim 1 : vector<8x256xf32>, i32 -> vector<8x256xf32>
    %c8 = arith.constant 8 : index
    %c0_46 = arith.constant 0 : index
    %c0_47 = arith.constant 0 : index
    %80 = vector.load %arg3[%c8, %c0_46, %c0_47] : memref<9x1x256xf32, #tpu.memory_space<vmem>>, vector<1x1x256xf32>
    %81 = vector.shape_cast %80 : vector<1x1x256xf32> to vector<1x256xf32>
    %82 = vector.broadcast %81 : vector<1x256xf32> to vector<32x256xf32>
    %83 = arith.mulf %78, %82 : vector<32x256xf32>
    %c256 = arith.constant 256 : index
    %c0_48 = arith.constant 0 : index
    %84 = vector.load %arg6[%c256, %c0_48] : memref<368x256xf32, #tpu.memory_space<vmem>>, vector<32x256xf32>
    tpu.vector_store %arg6[%c256, %c0_48], %83 {strides = array<i32>} : memref<368x256xf32, #tpu.memory_space<vmem>>, vector<32x256xf32>,
    %85 = vector.broadcast %81 : vector<1x256xf32> to vector<8x256xf32>
    %86 = arith.mulf %79, %85 : vector<8x256xf32>
    %c352 = arith.constant 352 : index
    %c0_49 = arith.constant 0 : index
    %87 = vector.load %arg6[%c352, %c0_49] : memref<368x256xf32, #tpu.memory_space<vmem>>, vector<8x256xf32>
    tpu.vector_store %arg6[%c352, %c0_49], %86 {strides = array<i32>} : memref<368x256xf32, #tpu.memory_space<vmem>>, vector<8x256xf32>,
    %c0_50 = arith.constant 0 : index
    %c0_51 = arith.constant 0 : index
    %88 = vector.load %arg4[%c0_50, %c0_51] : memref<128x368xf32, #tpu.memory_space<vmem>>, vector<128x368xf32>
    %c0_52 = arith.constant 0 : index
    %c0_53 = arith.constant 0 : index
    %89 = vector.load %arg6[%c0_52, %c0_53] : memref<368x256xf32, #tpu.memory_space<vmem>>, vector<368x256xf32>
    %cst = arith.constant dense<0.000000e+00> : vector<128x256xf32>
    %90 = tpu.matmul %88, %89, %cst {dimension_numbers = #tpu.dot_dimension_numbers<[1], [0], [0], [1], [0, 0, 1, 1], [], []>} : vector<128x368xf32>, vector<368x256xf32>, vector<128x256xf32> -> vector<128x256xf32>
    %c0_54 = arith.constant 0 : index
    %c0_55 = arith.constant 0 : index
    %91 = vector.load %arg7[%c0_54, %c0_55] : memref<128x256xf32, #tpu.memory_space<vmem>>, vector<128x256xf32>
    tpu.vector_store %arg7[%c0_54, %c0_55], %90 {strides = array<i32>} : memref<128x256xf32, #tpu.memory_space<vmem>>, vector<128x256xf32>,
    %c0_56 = arith.constant 0 : index
    %c0_57 = arith.constant 0 : index
    %92 = vector.load %arg7[%c0_56, %c0_57] : memref<128x256xf32, #tpu.memory_space<vmem>>, vector<8x256xf32>
    %cst_58 = arith.constant 5.000000e-01 : f32
    %93 = vector.broadcast %cst_58 : f32 to vector<8x256xf32>
    %94 = arith.mulf %93, %92 : vector<8x256xf32>
    %95 = math.tanh %94 : vector<8x256xf32>
    %cst_59 = arith.constant 5.000000e-01 : f32
    %96 = vector.broadcast %cst_59 : f32 to vector<8x256xf32>
    %97 = arith.mulf %96, %95 : vector<8x256xf32>
    %cst_60 = arith.constant 5.000000e-01 : f32
    %98 = vector.broadcast %cst_60 : f32 to vector<8x256xf32>
    %99 = arith.addf %97, %98 : vector<8x256xf32>
    %c32_61 = arith.constant 32 : index
    %c0_62 = arith.constant 0 : index
    %100 = vector.load %arg7[%c32_61, %c0_62] : memref<128x256xf32, #tpu.memory_space<vmem>>, vector<8x256xf32>
    %cst_63 = arith.constant 5.000000e-01 : f32
    %101 = vector.broadcast %cst_63 : f32 to vector<8x256xf32>
    %102 = arith.mulf %101, %100 : vector<8x256xf32>
    %103 = math.tanh %102 : vector<8x256xf32>
    %cst_64 = arith.constant 5.000000e-01 : f32
    %104 = vector.broadcast %cst_64 : f32 to vector<8x256xf32>
    %105 = arith.mulf %104, %103 : vector<8x256xf32>
    %cst_65 = arith.constant 5.000000e-01 : f32
    %106 = vector.broadcast %cst_65 : f32 to vector<8x256xf32>
    %107 = arith.addf %105, %106 : vector<8x256xf32>
    %c64_66 = arith.constant 64 : index
    %c0_67 = arith.constant 0 : index
    %108 = vector.load %arg7[%c64_66, %c0_67] : memref<128x256xf32, #tpu.memory_space<vmem>>, vector<8x256xf32>
    %cst_68 = arith.constant 5.000000e-01 : f32
    %109 = vector.broadcast %cst_68 : f32 to vector<8x256xf32>
    %110 = arith.mulf %109, %108 : vector<8x256xf32>
    %111 = math.tanh %110 : vector<8x256xf32>
    %cst_69 = arith.constant 5.000000e-01 : f32
    %112 = vector.broadcast %cst_69 : f32 to vector<8x256xf32>
    %113 = arith.mulf %112, %111 : vector<8x256xf32>
    %cst_70 = arith.constant 5.000000e-01 : f32
    %114 = vector.broadcast %cst_70 : f32 to vector<8x256xf32>
    %115 = arith.addf %113, %114 : vector<8x256xf32>
    %c96_71 = arith.constant 96 : index
    %c0_72 = arith.constant 0 : index
    %116 = vector.load %arg7[%c96_71, %c0_72] : memref<128x256xf32, #tpu.memory_space<vmem>>, vector<8x256xf32>
    %117 = math.tanh %116 : vector<8x256xf32>
    %c0_73 = arith.constant 0 : index
    %c0_74 = arith.constant 0 : index
    %118 = vector.load %arg9[%c0_73, %c0_74] : memref<32x256xf32, #tpu.memory_space<vmem>>, vector<8x256xf32>
    %119 = arith.mulf %107, %118 : vector<8x256xf32>
    %120 = arith.mulf %99, %117 : vector<8x256xf32>
    %121 = arith.addf %119, %120 : vector<8x256xf32>
    %122 = math.tanh %121 : vector<8x256xf32>
    %123 = arith.mulf %115, %122 : vector<8x256xf32>
    %c0_75 = arith.constant 0 : index
    %c0_76 = arith.constant 0 : index
    %124 = vector.load %arg9[%c0_75, %c0_76] : memref<32x256xf32, #tpu.memory_space<vmem>>, vector<8x256xf32>
    tpu.vector_store %arg9[%c0_75, %c0_76], %121 {strides = array<i32>} : memref<32x256xf32, #tpu.memory_space<vmem>>, vector<8x256xf32>,
    %c0_77 = arith.constant 0 : index
    %c0_78 = arith.constant 0 : index
    %125 = vector.load %arg8[%c0_77, %c0_78] : memref<32x256xf32, #tpu.memory_space<vmem>>, vector<8x256xf32>
    tpu.vector_store %arg8[%c0_77, %c0_78], %123 {strides = array<i32>} : memref<32x256xf32, #tpu.memory_space<vmem>>, vector<8x256xf32>,
    %c0_79 = arith.constant 0 : index
    %c0_80 = arith.constant 0 : index
    %c0_81 = arith.constant 0 : index
    %c0_82 = arith.constant 0 : index
    %126 = vector.load %arg5[%c0_79, %c0_80, %c0_81, %c0_82] : memref<1x1x32x256xf32, #tpu.memory_space<vmem>>, vector<1x1x8x256xf32>
    %127 = vector.shape_cast %126 : vector<1x1x8x256xf32> to vector<8x256xf32>
    %128 = vector.shape_cast %123 : vector<8x256xf32> to vector<1x1x8x256xf32>
    tpu.vector_store %arg5[%c0_79, %c0_80, %c0_81, %c0_82], %128 {strides = array<i32>} : memref<1x1x32x256xf32, #tpu.memory_space<vmem>>, vector<1x1x8x256xf32>,
    %c8_83 = arith.constant 8 : index
    %c0_84 = arith.constant 0 : index
    %129 = vector.load %arg7[%c8_83, %c0_84] : memref<128x256xf32, #tpu.memory_space<vmem>>, vector<8x256xf32>
    %cst_85 = arith.constant 5.000000e-01 : f32
    %130 = vector.broadcast %cst_85 : f32 to vector<8x256xf32>
    %131 = arith.mulf %130, %129 : vector<8x256xf32>
    %132 = math.tanh %131 : vector<8x256xf32>
    %cst_86 = arith.constant 5.000000e-01 : f32
    %133 = vector.broadcast %cst_86 : f32 to vector<8x256xf32>
    %134 = arith.mulf %133, %132 : vector<8x256xf32>
    %cst_87 = arith.constant 5.000000e-01 : f32
    %135 = vector.broadcast %cst_87 : f32 to vector<8x256xf32>
    %136 = arith.addf %134, %135 : vector<8x256xf32>
    %c40 = arith.constant 40 : index
    %c0_88 = arith.constant 0 : index
    %137 = vector.load %arg7[%c40, %c0_88] : memref<128x256xf32, #tpu.memory_space<vmem>>, vector<8x256xf32>
    %cst_89 = arith.constant 5.000000e-01 : f32
    %138 = vector.broadcast %cst_89 : f32 to vector<8x256xf32>
    %139 = arith.mulf %138, %137 : vector<8x256xf32>
    %140 = math.tanh %139 : vector<8x256xf32>
    %cst_90 = arith.constant 5.000000e-01 : f32
    %141 = vector.broadcast %cst_90 : f32 to vector<8x256xf32>
    %142 = arith.mulf %141, %140 : vector<8x256xf32>
    %cst_91 = arith.constant 5.000000e-01 : f32
    %143 = vector.broadcast %cst_91 : f32 to vector<8x256xf32>
    %144 = arith.addf %142, %143 : vector<8x256xf32>
    %c72 = arith.constant 72 : index
    %c0_92 = arith.constant 0 : index
    %145 = vector.load %arg7[%c72, %c0_92] : memref<128x256xf32, #tpu.memory_space<vmem>>, vector<8x256xf32>
    %cst_93 = arith.constant 5.000000e-01 : f32
    %146 = vector.broadcast %cst_93 : f32 to vector<8x256xf32>
    %147 = arith.mulf %146, %145 : vector<8x256xf32>
    %148 = math.tanh %147 : vector<8x256xf32>
    %cst_94 = arith.constant 5.000000e-01 : f32
    %149 = vector.broadcast %cst_94 : f32 to vector<8x256xf32>
    %150 = arith.mulf %149, %148 : vector<8x256xf32>
    %cst_95 = arith.constant 5.000000e-01 : f32
    %151 = vector.broadcast %cst_95 : f32 to vector<8x256xf32>
    %152 = arith.addf %150, %151 : vector<8x256xf32>
    %c104 = arith.constant 104 : index
    %c0_96 = arith.constant 0 : index
    %153 = vector.load %arg7[%c104, %c0_96] : memref<128x256xf32, #tpu.memory_space<vmem>>, vector<8x256xf32>
    %154 = math.tanh %153 : vector<8x256xf32>
    %c8_97 = arith.constant 8 : index
    %c0_98 = arith.constant 0 : index
    %155 = vector.load %arg9[%c8_97, %c0_98] : memref<32x256xf32, #tpu.memory_space<vmem>>, vector<8x256xf32>
    %156 = arith.mulf %144, %155 : vector<8x256xf32>
    %157 = arith.mulf %136, %154 : vector<8x256xf32>
    %158 = arith.addf %156, %157 : vector<8x256xf32>
    %159 = math.tanh %158 : vector<8x256xf32>
    %160 = arith.mulf %152, %159 : vector<8x256xf32>
    %c8_99 = arith.constant 8 : index
    %c0_100 = arith.constant 0 : index
    %161 = vector.load %arg9[%c8_99, %c0_100] : memref<32x256xf32, #tpu.memory_space<vmem>>, vector<8x256xf32>
    tpu.vector_store %arg9[%c8_99, %c0_100], %158 {strides = array<i32>} : memref<32x256xf32, #tpu.memory_space<vmem>>, vector<8x256xf32>,
    %c8_101 = arith.constant 8 : index
    %c0_102 = arith.constant 0 : index
    %162 = vector.load %arg8[%c8_101, %c0_102] : memref<32x256xf32, #tpu.memory_space<vmem>>, vector<8x256xf32>
    tpu.vector_store %arg8[%c8_101, %c0_102], %160 {strides = array<i32>} : memref<32x256xf32, #tpu.memory_space<vmem>>, vector<8x256xf32>,
    %c0_103 = arith.constant 0 : index
    %c0_104 = arith.constant 0 : index
    %c8_105 = arith.constant 8 : index
    %c0_106 = arith.constant 0 : index
    %163 = vector.load %arg5[%c0_103, %c0_104, %c8_105, %c0_106] : memref<1x1x32x256xf32, #tpu.memory_space<vmem>>, vector<1x1x8x256xf32>
    %164 = vector.shape_cast %163 : vector<1x1x8x256xf32> to vector<8x256xf32>
    %165 = vector.shape_cast %160 : vector<8x256xf32> to vector<1x1x8x256xf32>
    tpu.vector_store %arg5[%c0_103, %c0_104, %c8_105, %c0_106], %165 {strides = array<i32>} : memref<1x1x32x256xf32, #tpu.memory_space<vmem>>, vector<1x1x8x256xf32>,
    %c16 = arith.constant 16 : index
    %c0_107 = arith.constant 0 : index
    %166 = vector.load %arg7[%c16, %c0_107] : memref<128x256xf32, #tpu.memory_space<vmem>>, vector<8x256xf32>
    %cst_108 = arith.constant 5.000000e-01 : f32
    %167 = vector.broadcast %cst_108 : f32 to vector<8x256xf32>
    %168 = arith.mulf %167, %166 : vector<8x256xf32>
    %169 = math.tanh %168 : vector<8x256xf32>
    %cst_109 = arith.constant 5.000000e-01 : f32
    %170 = vector.broadcast %cst_109 : f32 to vector<8x256xf32>
    %171 = arith.mulf %170, %169 : vector<8x256xf32>
    %cst_110 = arith.constant 5.000000e-01 : f32
    %172 = vector.broadcast %cst_110 : f32 to vector<8x256xf32>
    %173 = arith.addf %171, %172 : vector<8x256xf32>
    %c48 = arith.constant 48 : index
    %c0_111 = arith.constant 0 : index
    %174 = vector.load %arg7[%c48, %c0_111] : memref<128x256xf32, #tpu.memory_space<vmem>>, vector<8x256xf32>
    %cst_112 = arith.constant 5.000000e-01 : f32
    %175 = vector.broadcast %cst_112 : f32 to vector<8x256xf32>
    %176 = arith.mulf %175, %174 : vector<8x256xf32>
    %177 = math.tanh %176 : vector<8x256xf32>
    %cst_113 = arith.constant 5.000000e-01 : f32
    %178 = vector.broadcast %cst_113 : f32 to vector<8x256xf32>
    %179 = arith.mulf %178, %177 : vector<8x256xf32>
    %cst_114 = arith.constant 5.000000e-01 : f32
    %180 = vector.broadcast %cst_114 : f32 to vector<8x256xf32>
    %181 = arith.addf %179, %180 : vector<8x256xf32>
    %c80 = arith.constant 80 : index
    %c0_115 = arith.constant 0 : index
    %182 = vector.load %arg7[%c80, %c0_115] : memref<128x256xf32, #tpu.memory_space<vmem>>, vector<8x256xf32>
    %cst_116 = arith.constant 5.000000e-01 : f32
    %183 = vector.broadcast %cst_116 : f32 to vector<8x256xf32>
    %184 = arith.mulf %183, %182 : vector<8x256xf32>
    %185 = math.tanh %184 : vector<8x256xf32>
    %cst_117 = arith.constant 5.000000e-01 : f32
    %186 = vector.broadcast %cst_117 : f32 to vector<8x256xf32>
    %187 = arith.mulf %186, %185 : vector<8x256xf32>
    %cst_118 = arith.constant 5.000000e-01 : f32
    %188 = vector.broadcast %cst_118 : f32 to vector<8x256xf32>
    %189 = arith.addf %187, %188 : vector<8x256xf32>
    %c112 = arith.constant 112 : index
    %c0_119 = arith.constant 0 : index
    %190 = vector.load %arg7[%c112, %c0_119] : memref<128x256xf32, #tpu.memory_space<vmem>>, vector<8x256xf32>
    %191 = math.tanh %190 : vector<8x256xf32>
    %c16_120 = arith.constant 16 : index
    %c0_121 = arith.constant 0 : index
    %192 = vector.load %arg9[%c16_120, %c0_121] : memref<32x256xf32, #tpu.memory_space<vmem>>, vector<8x256xf32>
    %193 = arith.mulf %181, %192 : vector<8x256xf32>
    %194 = arith.mulf %173, %191 : vector<8x256xf32>
    %195 = arith.addf %193, %194 : vector<8x256xf32>
    %196 = math.tanh %195 : vector<8x256xf32>
    %197 = arith.mulf %189, %196 : vector<8x256xf32>
    %c16_122 = arith.constant 16 : index
    %c0_123 = arith.constant 0 : index
    %198 = vector.load %arg9[%c16_122, %c0_123] : memref<32x256xf32, #tpu.memory_space<vmem>>, vector<8x256xf32>
    tpu.vector_store %arg9[%c16_122, %c0_123], %195 {strides = array<i32>} : memref<32x256xf32, #tpu.memory_space<vmem>>, vector<8x256xf32>,
    %c16_124 = arith.constant 16 : index
    %c0_125 = arith.constant 0 : index
    %199 = vector.load %arg8[%c16_124, %c0_125] : memref<32x256xf32, #tpu.memory_space<vmem>>, vector<8x256xf32>
    tpu.vector_store %arg8[%c16_124, %c0_125], %197 {strides = array<i32>} : memref<32x256xf32, #tpu.memory_space<vmem>>, vector<8x256xf32>,
    %c0_126 = arith.constant 0 : index
    %c0_127 = arith.constant 0 : index
    %c16_128 = arith.constant 16 : index
    %c0_129 = arith.constant 0 : index
    %200 = vector.load %arg5[%c0_126, %c0_127, %c16_128, %c0_129] : memref<1x1x32x256xf32, #tpu.memory_space<vmem>>, vector<1x1x8x256xf32>
    %201 = vector.shape_cast %200 : vector<1x1x8x256xf32> to vector<8x256xf32>
    %202 = vector.shape_cast %197 : vector<8x256xf32> to vector<1x1x8x256xf32>
    tpu.vector_store %arg5[%c0_126, %c0_127, %c16_128, %c0_129], %202 {strides = array<i32>} : memref<1x1x32x256xf32, #tpu.memory_space<vmem>>, vector<1x1x8x256xf32>,
    %c24 = arith.constant 24 : index
    %c0_130 = arith.constant 0 : index
    %203 = vector.load %arg7[%c24, %c0_130] : memref<128x256xf32, #tpu.memory_space<vmem>>, vector<8x256xf32>
    %cst_131 = arith.constant 5.000000e-01 : f32
    %204 = vector.broadcast %cst_131 : f32 to vector<8x256xf32>
    %205 = arith.mulf %204, %203 : vector<8x256xf32>
    %206 = math.tanh %205 : vector<8x256xf32>
    %cst_132 = arith.constant 5.000000e-01 : f32
    %207 = vector.broadcast %cst_132 : f32 to vector<8x256xf32>
    %208 = arith.mulf %207, %206 : vector<8x256xf32>
    %cst_133 = arith.constant 5.000000e-01 : f32
    %209 = vector.broadcast %cst_133 : f32 to vector<8x256xf32>
    %210 = arith.addf %208, %209 : vector<8x256xf32>
    %c56 = arith.constant 56 : index
    %c0_134 = arith.constant 0 : index
    %211 = vector.load %arg7[%c56, %c0_134] : memref<128x256xf32, #tpu.memory_space<vmem>>, vector<8x256xf32>
    %cst_135 = arith.constant 5.000000e-01 : f32
    %212 = vector.broadcast %cst_135 : f32 to vector<8x256xf32>
    %213 = arith.mulf %212, %211 : vector<8x256xf32>
    %214 = math.tanh %213 : vector<8x256xf32>
    %cst_136 = arith.constant 5.000000e-01 : f32
    %215 = vector.broadcast %cst_136 : f32 to vector<8x256xf32>
    %216 = arith.mulf %215, %214 : vector<8x256xf32>
    %cst_137 = arith.constant 5.000000e-01 : f32
    %217 = vector.broadcast %cst_137 : f32 to vector<8x256xf32>
    %218 = arith.addf %216, %217 : vector<8x256xf32>
    %c88 = arith.constant 88 : index
    %c0_138 = arith.constant 0 : index
    %219 = vector.load %arg7[%c88, %c0_138] : memref<128x256xf32, #tpu.memory_space<vmem>>, vector<8x256xf32>
    %cst_139 = arith.constant 5.000000e-01 : f32
    %220 = vector.broadcast %cst_139 : f32 to vector<8x256xf32>
    %221 = arith.mulf %220, %219 : vector<8x256xf32>
    %222 = math.tanh %221 : vector<8x256xf32>
    %cst_140 = arith.constant 5.000000e-01 : f32
    %223 = vector.broadcast %cst_140 : f32 to vector<8x256xf32>
    %224 = arith.mulf %223, %222 : vector<8x256xf32>
    %cst_141 = arith.constant 5.000000e-01 : f32
    %225 = vector.broadcast %cst_141 : f32 to vector<8x256xf32>
    %226 = arith.addf %224, %225 : vector<8x256xf32>
    %c120 = arith.constant 120 : index
    %c0_142 = arith.constant 0 : index
    %227 = vector.load %arg7[%c120, %c0_142] : memref<128x256xf32, #tpu.memory_space<vmem>>, vector<8x256xf32>
    %228 = math.tanh %227 : vector<8x256xf32>
    %c24_143 = arith.constant 24 : index
    %c0_144 = arith.constant 0 : index
    %229 = vector.load %arg9[%c24_143, %c0_144] : memref<32x256xf32, #tpu.memory_space<vmem>>, vector<8x256xf32>
    %230 = arith.mulf %218, %229 : vector<8x256xf32>
    %231 = arith.mulf %210, %228 : vector<8x256xf32>
    %232 = arith.addf %230, %231 : vector<8x256xf32>
    %233 = math.tanh %232 : vector<8x256xf32>
    %234 = arith.mulf %226, %233 : vector<8x256xf32>
    %c24_145 = arith.constant 24 : index
    %c0_146 = arith.constant 0 : index
    %235 = vector.load %arg9[%c24_145, %c0_146] : memref<32x256xf32, #tpu.memory_space<vmem>>, vector<8x256xf32>
    tpu.vector_store %arg9[%c24_145, %c0_146], %232 {strides = array<i32>} : memref<32x256xf32, #tpu.memory_space<vmem>>, vector<8x256xf32>,
    %c24_147 = arith.constant 24 : index
    %c0_148 = arith.constant 0 : index
    %236 = vector.load %arg8[%c24_147, %c0_148] : memref<32x256xf32, #tpu.memory_space<vmem>>, vector<8x256xf32>
    tpu.vector_store %arg8[%c24_147, %c0_148], %234 {strides = array<i32>} : memref<32x256xf32, #tpu.memory_space<vmem>>, vector<8x256xf32>,
    %c0_149 = arith.constant 0 : index
    %c0_150 = arith.constant 0 : index
    %c24_151 = arith.constant 24 : index
    %c0_152 = arith.constant 0 : index
    %237 = vector.load %arg5[%c0_149, %c0_150, %c24_151, %c0_152] : memref<1x1x32x256xf32, #tpu.memory_space<vmem>>, vector<1x1x8x256xf32>
    %238 = vector.shape_cast %237 : vector<1x1x8x256xf32> to vector<8x256xf32>
    %239 = vector.shape_cast %234 : vector<8x256xf32> to vector<1x1x8x256xf32>
    tpu.vector_store %arg5[%c0_149, %c0_150, %c24_151, %c0_152], %239 {strides = array<i32>} : memref<1x1x32x256xf32, #tpu.memory_space<vmem>>, vector<1x1x8x256xf32>,
    return
  }
  func.func @transform_0(%arg0: i32, %arg1: i32) -> (i32, i32, i32, i32) {
    %c0_i32 = arith.constant 0 : i32
    %c0_i32_0 = arith.constant 0 : i32
    %c0_i32_1 = arith.constant 0 : i32
    return %arg0, %arg1, %c0_i32, %c0_i32_0 : i32, i32, i32, i32
  }
  func.func @transform_1(%arg0: i32, %arg1: i32) -> (i32, i32, i32) {
    %c0_i32 = arith.constant 0 : i32
    %c0_i32_0 = arith.constant 0 : i32
    %c0_i32_1 = arith.constant 0 : i32
    %c0_i32_2 = arith.constant 0 : i32
    return %c0_i32, %c0_i32_0, %c0_i32_1 : i32, i32, i32
  }
  func.func @transform_2(%arg0: i32, %arg1: i32) -> (i32, i32) {
    %c0_i32 = arith.constant 0 : i32
    %c0_i32_0 = arith.constant 0 : i32
    %c0_i32_1 = arith.constant 0 : i32
    return %c0_i32, %c0_i32_0 : i32, i32
  }
  func.func @transform_3(%arg0: i32, %arg1: i32) -> (i32, i32, i32, i32) {
    %c0_i32 = arith.constant 0 : i32
    %c0_i32_0 = arith.constant 0 : i32
    %c0_i32_1 = arith.constant 0 : i32
    return %arg0, %arg1, %c0_i32, %c0_i32_0 : i32, i32, i32, i32
  }
}

</mosaic_0001>

<bundles_post_ra>
// kernel: conv_lstm_forward.1
= control target key start
LH: loop header
LB: loop body
LE: loop exit
PB: predicated region body
PF: predicated region fallthrough
CT: control target
= control target key end

     0   :  { %s1849_s12 = smov 0   ;;  %s1851_s13 = smov 0   ;;  %s2634_s0 = inlined_call_operand.vmem [shape: f32[2,8,8,256], index: 0, kind: input, shape index: {}]   ;;  %s2635_s1 = inlined_call_operand.vmem [shape: f32[9,1,256], index: 1, kind: input, shape index: {}]   ;;  %s2636_s2 = inlined_call_operand.vmem [shape: f32[128,368], index: 2, kind: input, shape index: {}]   ;;  %s2637_s3 = inlined_call_operand.vmem [shape: f32[2,8,32,256], index: 3, kind: output, shape index: {}]  }
   0x1   :  { %s1853_s14 = smov 0   ;;  %s1855_s15 = smov 0  }
   0x2   :  { %s1857_s16 = smov 0  }
   0x3 LB: > { %s22_s17 = sadd.s32 1, %s1809_s14  ;;  %s25_s18 = sadd.s32 1, %s1813_s15  ;;  %s1817_s16 = sphi %s1857_s16, %s13_s16   ;;  %s1813_s15 = sphi %s1855_s15, %s2641_s15   ;;  %s1809_s14 = sphi %s1853_s14, %s2640_s14   ;;  %s1805_s13 = sphi %s1851_s13, %s2639_s13   ;;  %s1801_s12 = sphi %s1849_s12, %s2638_s12  }
   0x4   : > { %p23_p0 = scmp.ge.s32.totalorder %s22_s17, 8  ;;  %p1616_p1 = scmp.ge.s32.totalorder %s1817_s16, 1 }
   0x5   : > { %p157_p2 = scmp.lt.s32.totalorder %s1817_s16, 17 }
   0x6   : > { %s2643_s17 = smov (%p23_p0, %s22_s17), 0  ;;  %s2645_s18 = smov (!%p23_p0, %s25_s18), %s1813_s15 }
   0x7   : > { %p158_p3 = pnand %p1616_p1, %p157_p2  ;;  %p27_p4 = scmp.ge.s32.totalorder %s2645_s18, 2 }
   0x8   : > { %p189_p5 = scmp.lt.s32.totalorder (!%p158_p3), %s1805_s13, 1  ;;  %p191_p6 = scmp.lt.s32.totalorder (!%p158_p3), %s1801_s12, 7 }
   0x9   : > { %s2647_s18 = smov (%p27_p4, %s2645_s18), 0  ;;  %161 = sbr.rel (%p158_p3) target bundleno = 606 (0x25e), region = 32 }
   0xa   : > { %p1623_p7 = scmp.ne.s32.totalorder (!%p158_p3), %s1801_s12, 0 }
   0xe   : > { %s2649_s13 = smov (!%p189_p5, %s1805_s13), 1 }
   0xf   : > { %s192_s19 = scalar_select %p191_p6, %s1801_s12, 7 }
  0x10   : > { %s1618_s20 = sshll.u32 %s2649_s13, 4  ;;  %s1621_s21 = sshll.u32 %s2649_s13, 6 }
  0x11   : > { %s1617_s22 = sshll.u32 %s192_s19, 1  ;;  %s1620_s23 = sshll.u32 %s192_s19, 3 }
  0x12   : > { %s195_s24 = sadd.s32 %s1618_s20, %s1617_s22  ;;  %s204_s25 = sadd.s32 %s1621_s21, %s1620_s23 }
  0x13   : > { %s1619_s26 = sshll.u32 %s195_s24, 3  ;;  %s1622_s27 = sshll.u32 %s204_s25, 3 }
  0x14   : > { %s1886_s30 = scalar_lea.vmem %s2634_s0, %s1619_s26  ;;  %s1891_s6 = scalar_lea.vmem %s2637_s3, %s1622_s27 }
  0x15   : > { %210 = sbr.rel (%p1623_p7) target bundleno = 36 (0x24), region = 36 }
  0x1a   : > { %v227_v0 = vlaneseq  ;;  %v1819_v1 = vmov 0.0  }
  0x1b   : > { %211 = vst [vmem:[#allocation4 + $0x18] sm:$0xff] %v1819_v1  ;;  %212 = vst [vmem:[#allocation4 + $0x38] sm:$0xff] %v1819_v1 }
  0x1c   : > { %213 = vst [vmem:[#allocation4 + $0x28] sm:$0xff] %v1819_v1  ;;  %214 = vst [vmem:[#allocation4 + $0x10] sm:$0xff] %v1819_v1  ;;  %v228_v2 = vshrl.u32 %v227_v0, 7 }
  0x1d   : > { %215 = vst [vmem:[#allocation4 + $0x8] sm:$0xff] %v1819_v1  ;;  %216 = vst [vmem:[#allocation4 + $0x20] sm:$0xff] %v1819_v1 }
  0x1e   : > { %217 = vst [vmem:[#allocation4 + $0x30] sm:$0xff] %v1819_v1  ;;  %218 = vst [vmem:[#allocation4] sm:$0xff] %v1819_v1  ;;  %vm229_vm0 = vcmp.eq.s32.totalorder %v228_v2, 0 }
  0x1f   : > { %219 = vst [vmem:[#allocation5] sm:$0xff] %v1819_v1  ;;  %220 = vst [vmem:[#allocation5 + $0x8] sm:$0xff] %v1819_v1  ;;  %v230_v3 = vsel %vm229_vm0, 1.0, %v1819_v1 }
  0x20   : > { %221 = vst [vmem:[#allocation5 + $0x20] sm:$0xff] %v1819_v1  ;;  %222 = vst [vmem:[#allocation5 + $0x18] sm:$0xff] %v1819_v1 }
  0x21   : > { %223 = vst [vmem:[#allocation5 + $0x38] sm:$0xff] %v1819_v1  ;;  %224 = vst [vmem:[#allocation5 + $0x30] sm:$0xff] %v1819_v1 }
  0x22   : > { %225 = vst [vmem:[#allocation5 + $0x10] sm:$0xff] %v1819_v1  ;;  %226 = vst [vmem:[#allocation5 + $0x28] sm:$0xff] %v1819_v1 }
  0x23   : > { %231 = vst [vmem:[#allocation2 + $0x220] sm:$0xff] %v230_v3  ;;  %232 = vst [vmem:[#allocation2 + $0xa0] sm:$0xff] %v230_v3 }
  0x24 PF: > { %v1896_v5 = vld [vmem:[#allocation4 + $0x8] sm:$0xff]  ;;  %s1820_s7 = smov 1   ;;  %v1907_v7 = vld [vmem:[#allocation4 + $0x20] sm:$0xff]  ;;  %v1909_v8 = vld [vmem:[#allocation4 + $0x10] sm:$0xff]  ;;  %s1821_s8 = smov 15   ;;  %v259_v16 = vlaneseq  ;;  %vm906_vm9 = vcmask 916480  }
  0x25   : > { %v1894_v4 = vld [vmem:[#allocation4 + $0x30] sm:$0xff]  ;;  %v1898_v6 = vld [vmem:[#allocation4] sm:$0xff]  ;;  %440 = vrot.lane.b32.xlu1 %v1896_v5, %s1820_s7  ;;  %504 = vst [vmem:[#allocation2 + $0x1a0] sm:$0xff] %v1896_v5  ;;  %v1911_v9 = vld [vmem:[#allocation4 + $0x28] sm:$0xff]  ;;  %s1822_s9 = smov 16   ;;  %s1823_s10 = smov 17  }
  0x26   : > { %442 = vrot.lane.b32.xlu0 %v1894_v4, %s1820_s7  ;;  %506 = vst [vmem:[#allocation2 + $0x238] sm:$0xff] %v1894_v4  ;;  %507 = vst [vmem:[#allocation2 + $0x298] sm:$0xff] %v1898_v6  ;;  %v1916_v10 = vld [vmem:[#allocation4 + $0x38] sm:$0xff]  ;;  %v1921_v12 = vld [vmem:[%s1886_s30 + $0x8] sm:$0xff]  ;;  %s1824_s11 = smov 112   ;;  %s1825_s12 = smov 111  }
  0x27   : > { %505 = vst [vmem:[#allocation2 + $0x290] sm:$0xff] %v1907_v7  ;;  %503 = vst [vmem:[#allocation2 + $0x210] sm:$0xff] %v1909_v8  ;;  %v1918_v11 = vld [vmem:[#allocation4 + $0x18] sm:$0xff]  ;;  %v1926_v13 = vld [vmem:[%s1886_s30] sm:$0xff]  ;;  %s1826_s13 = smov 113   ;;  %s1827_s19 = smov 127  }
  0x28   : > { %502 = vst [vmem:[#allocation2 + $0x258] sm:$0xff] %v1911_v9  ;;  %501 = vst [vmem:[#allocation2 + $0x150] sm:$0xff] %v1916_v10  ;;  %v279_v17 = vshrl.u32 %v259_v16, 7  ;;  %v2020_v18 = vand.u32 127, %v259_v16  ;;  %v1626_v21 = vld [vmem:[%s2635_s1 + $0x6] sm:$0x3] }
  0x29   : > { %500 = vst [vmem:[#allocation2 + $0xc0] sm:$0xff] %v1918_v11  ;;  %448 = vrot.lane.b32.xlu1 %v1907_v7, %s1820_s7  ;;  %v1625_v42 = vld [vmem:[%s2635_s1 + $0x4] sm:$0x3] }
  0x2a   : > { %450 = vrot.lane.b32.xlu0 %v1898_v6, %s1820_s7  ;;  %v905_v14 = vld [vmem:[#allocation2 + $0xa0] sm:$0xff]  ;;  %v2022_v19 = vsub.s32 0, %v279_v17  ;;  %v2024_v20 = vsub.s32 1, %v279_v17  ;;  %vm452_vm1 = vcmp.lt.s32.totalorder %v2020_v18, 1  ;;  %vm388_vm2 = vcmp.lt.s32.totalorder %v2020_v18, 15 }
  0x2b   : > { %1120 = vmatprep.subr.mxu1 %v905_v14  ;;  %v904_v15 = vld [vmem:[#allocation2 + $0x220] sm:$0xff]  ;;  %vm324_vm3 = vcmp.lt.s32.totalorder %v2020_v18, 16  ;;  %vm261_vm4 = vcmp.lt.s32.totalorder %v2020_v18, 17  ;;  %vm654_vm5 = vcmp.lt.s32.totalorder %v2020_v18, 112  ;;  %vm718_vm6 = vcmp.lt.s32.totalorder %v2020_v18, 111 }
  0x2c   : > { %1121 = vmatpush1.msra.mxu1 %v904_v15  ;;  %v2035_v24 = vrot.slane %v1626_v21, %v2022_v19  ;;  %v2038_v25 = vrot.slane %v1626_v21, %v2024_v20  ;;  %v2079_v49 = vrot.slane %v1625_v42, %v2022_v19  ;;  %v2082_v50 = vrot.slane %v1625_v42, %v2024_v20  ;;  %v1624_v15 = vld [vmem:[%s2635_s1 + $0x2] sm:$0x3] }
  0x2d   : > { %446 = vrot.lane.b32.xlu1 %v1909_v8, %s1820_s7  ;;  %vm590_vm7 = vcmp.lt.s32.totalorder %v2020_v18, 113  ;;  %vm526_vm8 = vcmp.lt.s32.totalorder %v2020_v18, 127  ;;  %v776_v18 = vld [vmem:[%s2636_s2 + $0x50] sm:$0xff] }
  0x2e   : > { %438 = vrot.lane.b32.xlu0 %v1911_v9, %s1820_s7 }
  0x31   : > { %444 = vrot.lane.b32.xlu1 %v1916_v10, %s1820_s7 }
  0x32   : > { %436 = vrot.lane.b32.xlu0 %v1918_v11, %s1820_s7 }
  0x35   : > { %386 = vrot.lane.b32.xlu1 %v1898_v6, %s1821_s8 }
  0x36   : > { %378 = vrot.lane.b32.xlu0 %v1894_v4, %s1821_s8 }
  0x39   : > { %384 = vrot.lane.b32.xlu1 %v1907_v7, %s1821_s8 }
  0x3a   : > { %376 = vrot.lane.b32.xlu0 %v1896_v5, %s1821_s8 }
  0x3d   : > { %382 = vrot.lane.b32.xlu1 %v1909_v8, %s1821_s8 }
  0x3e   : > { %374 = vrot.lane.b32.xlu0 %v1911_v9, %s1821_s8 }
  0x41   : > { %380 = vrot.lane.b32.xlu1 %v1916_v10, %s1821_s8 }
  0x42   : > { %372 = vrot.lane.b32.xlu0 %v1918_v11, %s1821_s8 }
  0x45   : > { %322 = vrot.lane.b32.xlu1 %v1898_v6, %s1822_s9 }
  0x46   : > { %314 = vrot.lane.b32.xlu0 %v1894_v4, %s1822_s9 }
  0x49   : > { %320 = vrot.lane.b32.xlu1 %v1907_v7, %s1822_s9 }
  0x4a   : > { %312 = vrot.lane.b32.xlu0 %v1896_v5, %s1822_s9 }
  0x4d   : > { %318 = vrot.lane.b32.xlu1 %v1909_v8, %s1822_s9 }
  0x4e   : > { %310 = vrot.lane.b32.xlu0 %v1911_v9, %s1822_s9 }
  0x51   : > { %316 = vrot.lane.b32.xlu1 %v1916_v10, %s1822_s9 }
  0x52   : > { %308 = vrot.lane.b32.xlu0 %v1918_v11, %s1822_s9 }
  0x55   : > { %257 = vrot.lane.b32.xlu1 %v1898_v6, %s1823_s10 }
  0x56   : > { %249 = vrot.lane.b32.xlu0 %v1894_v4, %s1823_s10 }
  0x59   : > { %255 = vrot.lane.b32.xlu1 %v1907_v7, %s1823_s10 }
  0x5a   : > { %247 = vrot.lane.b32.xlu0 %v1896_v5, %s1823_s10 }
  0x5d   : > { %253 = vrot.lane.b32.xlu1 %v1909_v8, %s1823_s10 }
  0x5e   : > { %245 = vrot.lane.b32.xlu0 %v1911_v9, %s1823_s10 }
  0x61   : > { %251 = vrot.lane.b32.xlu1 %v1916_v10, %s1823_s10 }
  0x62   : > { %243 = vrot.lane.b32.xlu0 %v1918_v11, %s1823_s10 }
  0x65   : > { %652 = vrot.lane.b32.xlu1 %v1898_v6, %s1824_s11 }
  0x66   : > { %644 = vrot.lane.b32.xlu0 %v1894_v4, %s1824_s11 }
  0x69   : > { %650 = vrot.lane.b32.xlu1 %v1907_v7, %s1824_s11 }
  0x6a   : > { %642 = vrot.lane.b32.xlu0 %v1896_v5, %s1824_s11 }
  0x6d   : > { %648 = vrot.lane.b32.xlu1 %v1909_v8, %s1824_s11 }
  0x6e   : > { %640 = vrot.lane.b32.xlu0 %v1911_v9, %s1824_s11 }
  0x71   : > { %646 = vrot.lane.b32.xlu1 %v1916_v10, %s1824_s11 }
  0x72   : > { %638 = vrot.lane.b32.xlu0 %v1918_v11, %s1824_s11 }
  0x75   : > { %729 = vrot.lane.b32.xlu1 %v1921_v12, %s1825_s12 }
  0x76   : > { %727 = vrot.lane.b32.xlu0 %v1926_v13, %s1825_s12 }
  0x79   : > { %588 = vrot.lane.b32.xlu1 %v1898_v6, %s1826_s13 }
  0x7a   : > { %580 = vrot.lane.b32.xlu0 %v1894_v4, %s1826_s13 }
  0x7d   : > { %665 = vrot.lane.b32.xlu1 %v1921_v12, %s1824_s11 }
  0x7e   : > { %663 = vrot.lane.b32.xlu0 %v1926_v13, %s1824_s11 }
  0x81   : > { %586 = vrot.lane.b32.xlu1 %v1907_v7, %s1826_s13 }
  0x82   : > { %578 = vrot.lane.b32.xlu0 %v1896_v5, %s1826_s13 }
  0x85   : > { %601 = vrot.lane.b32.xlu1 %v1921_v12, %s1826_s13 }
  0x86   : > { %599 = vrot.lane.b32.xlu0 %v1926_v13, %s1826_s13 }
  0x89   : > { %537 = vrot.lane.b32.xlu1 %v1921_v12, %s1827_s19 }
  0x8a   : > { %535 = vrot.lane.b32.xlu0 %v1926_v13, %s1827_s19 }
  0x8d   : > { %584 = vrot.lane.b32.xlu1 %v1909_v8, %s1826_s13 }
  0x8e   : > { %576 = vrot.lane.b32.xlu0 %v1911_v9, %s1826_s13 }
  0x91   : > { %582 = vrot.lane.b32.xlu1 %v1916_v10, %s1826_s13 }
  0x92   : > { %574 = vrot.lane.b32.xlu0 %v1918_v11, %s1826_s13 }
  0x95   : > { %463 = vrot.lane.b32.xlu1 %v1921_v12, %s1820_s7 }
  0x96   : > { %461 = vrot.lane.b32.xlu0 %v1926_v13, %s1820_s7 }
  0x97   : > { %v441_v23 = vpop.permute.xlu1 %440 }
  0x98   : > { %v443_v22 = vpop.permute.xlu0 %442 }
  0x99   : > { %524 = vrot.lane.b32.xlu1 %v1898_v6, %s1827_s19 }
  0x9a   : > { %516 = vrot.lane.b32.xlu0 %v1894_v4, %s1827_s19 }
  0x9b   : > { %v449_v27 = vpop.permute.xlu1 %448 }
  0x9c   : > { %v451_v26 = vpop.permute.xlu0 %450  ;;  %v455_v30 = vsel %vm452_vm1, %v441_v23, %v449_v27  ;;  %v459_v31 = vsel %vm452_vm1, %v449_v27, %v441_v23  ;;  %v2129_v27 = vrot.slane %v1624_v15, %v2022_v19 }
  0x9d   : > { %v456_v28 = vsel %vm452_vm1, %v443_v22, %v451_v26  ;;  %v460_v29 = vsel %vm452_vm1, %v451_v26, %v443_v22  ;;  %v484_v34 = vmul.f32 %v2035_v24, %v459_v31  ;;  %v485_v35 = vmul.f32 %v2038_v25, %v455_v30  ;;  %399 = vrot.lane.b32.xlu1 %v1921_v12, %s1821_s8 }
  0x9e   : > { %v486_v32 = vmul.f32 %v2035_v24, %v460_v29  ;;  %v487_v33 = vmul.f32 %v2038_v25, %v456_v28  ;;  %397 = vrot.lane.b32.xlu0 %v1926_v13, %s1821_s8  ;;  %v2132_v28 = vrot.slane %v1624_v15, %v2024_v20  ;;  %v767_v29 = vld [vmem:[%s2636_s2 + $0x8] sm:$0xff] }
  0x9f   : > { %v447_v36 = vpop.permute.xlu1 %446  ;;  %1019 = vmatprep.mubr.f32.mxu0 %v767_v29 }
  0xa0   : > { %v439_v37 = vpop.permute.xlu0 %438  ;;  %955 = vmatprep.subr.mxu0 %v487_v33 }
  0xa1   : > { %v454_v38 = vsel %vm452_vm1, %v439_v37, %v447_v36  ;;  %v458_v39 = vsel %vm452_vm1, %v447_v36, %v439_v37  ;;  %956 = vmatpush1.msra.mxu0 %v486_v32  ;;  %522 = vrot.lane.b32.xlu1 %v1907_v7, %s1827_s19 }
  0xa2   : > { %v482_v40 = vmul.f32 %v2035_v24, %v458_v39  ;;  %v483_v41 = vmul.f32 %v2038_v25, %v454_v38  ;;  %957 = vmatprep.subr.mxu0 %v485_v35  ;;  %514 = vrot.lane.b32.xlu0 %v1896_v5, %s1827_s19 }
  0xa3   : > { %958 = vmatpush1.msra.mxu0 %v484_v34  ;;  %v445_v43 = vpop.permute.xlu1 %444 }
  0xa4   : > { %v437_v44 = vpop.permute.xlu0 %436  ;;  %959 = vmatprep.subr.mxu0 %v483_v41 }
  0xa5   : > { %v453_v45 = vsel %vm452_vm1, %v437_v44, %v445_v43  ;;  %v457_v46 = vsel %vm452_vm1, %v445_v43, %v437_v44  ;;  %960 = vmatpush1.msra.mxu0 %v482_v40  ;;  %335 = vrot.lane.b32.xlu1 %v1921_v12, %s1822_s9 }
  0xa6   : > { %v480_v47 = vmul.f32 %v2035_v24, %v457_v46  ;;  %v481_v48 = vmul.f32 %v2038_v25, %v453_v45  ;;  %333 = vrot.lane.b32.xlu0 %v1926_v13, %s1822_s9 }
  0xa7   : > { %v387_v51 = vpop.permute.xlu1 %386 }
  0xa8   : > { %v379_v52 = vpop.permute.xlu0 %378  ;;  %961 = vmatprep.subr.mxu0 %v481_v48 }
  0xa9   : > { %v392_v53 = vsel %vm388_vm2, %v379_v52, %v387_v51  ;;  %v396_v54 = vsel %vm388_vm2, %v387_v51, %v379_v52  ;;  %962 = vmatpush1.msra.mxu0 %v480_v47  ;;  %520 = vrot.lane.b32.xlu1 %v1909_v8, %s1827_s19 }
  0xaa   : > { %v422_v55 = vmul.f32 %v2079_v49, %v396_v54  ;;  %v423_v56 = vmul.f32 %v2082_v50, %v392_v53  ;;  %512 = vrot.lane.b32.xlu0 %v1911_v9, %s1827_s19 }
  0xab   : > { %v385_v57 = vpop.permute.xlu1 %384 }
  0xac   : > { %v377_v58 = vpop.permute.xlu0 %376  ;;  %963 = vmatprep.subr.mxu0 %v423_v56 }
  0xad   : > { %v391_v59 = vsel %vm388_vm2, %v377_v58, %v385_v57  ;;  %v395_v60 = vsel %vm388_vm2, %v385_v57, %v377_v58  ;;  %964 = vmatpush1.msra.mxu0 %v422_v55  ;;  %272 = vrot.lane.b32.xlu1 %v1921_v12, %s1823_s10 }
  0xae   : > { %v420_v61 = vmul.f32 %v2079_v49, %v395_v60  ;;  %v421_v62 = vmul.f32 %v2082_v50, %v391_v59  ;;  %270 = vrot.lane.b32.xlu0 %v1926_v13, %s1823_s10 }
  0xaf   : > { %v383_v63 = vpop.permute.xlu1 %382 }
  0xb0   : > { %v375_v0 = vpop.permute.xlu0 %374  ;;  %965 = vmatprep.subr.mxu0 %v421_v62 }
  0xb1   : > { %v390_v1 = vsel %vm388_vm2, %v375_v0, %v383_v63  ;;  %v394_v2 = vsel %vm388_vm2, %v383_v63, %v375_v0  ;;  %966 = vmatpush1.msra.mxu0 %v420_v61  ;;  %518 = vrot.lane.b32.xlu1 %v1916_v10, %s1827_s19 }
  0xb2   : > { %v418_v3 = vmul.f32 %v2079_v49, %v394_v2  ;;  %v419_v14 = vmul.f32 %v2082_v50, %v390_v1  ;;  %510 = vrot.lane.b32.xlu0 %v1918_v11, %s1827_s19 }
  0xb3   : > { %v381_v16 = vpop.permute.xlu1 %380 }
  0xb4   : > { %v373_v17 = vpop.permute.xlu0 %372  ;;  %967 = vmatprep.subr.mxu0 %v419_v14 }
  0xb5   : > { %v389_v21 = vsel %vm388_vm2, %v373_v17, %v381_v16  ;;  %v393_v22 = vsel %vm388_vm2, %v381_v16, %v373_v17  ;;  %968 = vmatpush1.msra.mxu0 %v418_v3  ;;  %716 = vrot.lane.b32.xlu1 %v1898_v6, %s1825_s12  ;;  %v1629_v16 = vld [vmem:[%s2635_s1 + $0xe] sm:$0x3] }
  0xb6   : > { %v416_v23 = vmul.f32 %v2079_v49, %v393_v22  ;;  %v417_v26 = vmul.f32 %v2082_v50, %v389_v21  ;;  %708 = vrot.lane.b32.xlu0 %v1894_v4, %s1825_s12  ;;  %v1828_v4 = vmov 0.0  }
  0xb7   : > { %v323_v30 = vpop.permute.xlu1 %322  ;;  %1180 = vmatprep.mubr.f32.mxu1 %v1828_v4 }
  0xb8   : > { %v315_v31 = vpop.permute.xlu0 %314  ;;  %969 = vmatprep.subr.mxu0 %v417_v26 }
  0xb9   : > { %v328_v6 = vsel %vm324_vm3, %v315_v31, %v323_v30  ;;  %v332_v32 = vsel %vm324_vm3, %v323_v30, %v315_v31  ;;  %970 = vmatpush1.msra.mxu0 %v416_v23  ;;  %714 = vrot.lane.b32.xlu1 %v1907_v7, %s1825_s12  ;;  %v2215_v30 = vrot.slane %v1629_v16, %v2022_v19 }
  0xba   : > { %v358_v33 = vmul.f32 %v2129_v27, %v332_v32  ;;  %v359_v34 = vmul.f32 %v2132_v28, %v328_v6  ;;  %706 = vrot.lane.b32.xlu0 %v1896_v5, %s1825_s12  ;;  %v2218_v31 = vrot.slane %v1629_v16, %v2024_v20 }
  0xbb   : > { %v321_v35 = vpop.permute.xlu1 %320 }
  0xbc   : > { %v313_v36 = vpop.permute.xlu0 %312  ;;  %971 = vmatprep.subr.mxu0 %v359_v34 }
  0xbd   : > { %v327_v37 = vsel %vm324_vm3, %v313_v36, %v321_v35  ;;  %v331_v38 = vsel %vm324_vm3, %v321_v35, %v313_v36  ;;  %972 = vmatpush1.msra.mxu0 %v358_v33  ;;  %712 = vrot.lane.b32.xlu1 %v1909_v8, %s1825_s12  ;;  %v276_v8 = vld [vmem:[%s2635_s1] sm:$0x3] }
  0xbe   : > { %v356_v39 = vmul.f32 %v2129_v27, %v331_v38  ;;  %v357_v7 = vmul.f32 %v2132_v28, %v327_v37  ;;  %704 = vrot.lane.b32.xlu0 %v1911_v9, %s1825_s12  ;;  %v2181_v48 = vrot.slane %v276_v8, %v2022_v19  ;;  %v2184_v51 = vrot.slane %v276_v8, %v2024_v20 }
  0xbf   : > { %v319_v5 = vpop.permute.xlu1 %318 }
  0xc0   : > { %v311_v40 = vpop.permute.xlu0 %310  ;;  %973 = vmatprep.subr.mxu0 %v357_v7 }
  0xc1   : > { %v326_v41 = vsel %vm324_vm3, %v311_v40, %v319_v5  ;;  %v330_v42 = vsel %vm324_vm3, %v319_v5, %v311_v40  ;;  %974 = vmatpush1.msra.mxu0 %v356_v39  ;;  %710 = vrot.lane.b32.xlu1 %v1916_v10, %s1825_s12 }
  0xc2   : > { %v354_v43 = vmul.f32 %v2129_v27, %v330_v42  ;;  %v355_v44 = vmul.f32 %v2132_v28, %v326_v41  ;;  %702 = vrot.lane.b32.xlu0 %v1918_v11, %s1825_s12 }
  0xc3   : > { %v317_v9 = vpop.permute.xlu1 %316 }
  0xc4   : > { %v309_v45 = vpop.permute.xlu0 %308  ;;  %975 = vmatprep.subr.mxu0 %v355_v44 }
  0xc5   : > { %v325_v46 = vsel %vm324_vm3, %v309_v45, %v317_v9  ;;  %v329_v47 = vsel %vm324_vm3, %v317_v9, %v309_v45  ;;  %976 = vmatpush1.msra.mxu0 %v354_v43  ;;  %v1630_v45 = vld [vmem:[%s2635_s1 + $0x10] sm:$0x3] }
  0xc6   : > { %v352_v10 = vmul.f32 %v2129_v27, %v329_v47  ;;  %v353_v11 = vmul.f32 %v2132_v28, %v325_v46 }
  0xc7   : > { %v258_v52 = vpop.permute.xlu1 %257 }
  0xc8   : > { %v250_v53 = vpop.permute.xlu0 %249  ;;  %977 = vmatprep.subr.mxu0 %v353_v11 }
  0xc9   : > { %v265_v54 = vsel %vm261_vm4, %v250_v53, %v258_v52  ;;  %v269_v55 = vsel %vm261_vm4, %v258_v52, %v250_v53  ;;  %978 = vmatpush1.msra.mxu0 %v352_v10 }
  0xca   : > { %v294_v56 = vmul.f32 %v2181_v48, %v269_v55  ;;  %v295_v57 = vmul.f32 %v2184_v51, %v265_v54  ;;  %v2249_v54 = vrot.slane %v1630_v45, %v2022_v19  ;;  %v2252_v55 = vrot.slane %v1630_v45, %v2024_v20 }
  0xcb   : > { %v256_v58 = vpop.permute.xlu1 %255 }
  0xcc   : > { %v248_v59 = vpop.permute.xlu0 %247  ;;  %979 = vmatprep.subr.mxu0 %v295_v57 }
  0xcd   : > { %v264_v60 = vsel %vm261_vm4, %v248_v59, %v256_v58  ;;  %v268_v61 = vsel %vm261_vm4, %v256_v58, %v248_v59  ;;  %980 = vmatpush1.msra.mxu0 %v294_v56  ;;  %v1628_v56 = vld [vmem:[%s2635_s1 + $0xc] sm:$0x3] }
  0xce   : > { %v292_v62 = vmul.f32 %v2181_v48, %v268_v61  ;;  %v293_v63 = vmul.f32 %v2184_v51, %v264_v60 }
  0xcf   : > { %v254_v0 = vpop.permute.xlu1 %253 }
  0xd0   : > { %v246_v1 = vpop.permute.xlu0 %245  ;;  %981 = vmatprep.subr.mxu0 %v293_v63  ;;  %v611_v63 = vrot.slane %v1628_v56, %v2022_v19 }
  0xd1   : > { %v263_v2 = vsel %vm261_vm4, %v246_v1, %v254_v0  ;;  %v267_v3 = vsel %vm261_vm4, %v254_v0, %v246_v1  ;;  %982 = vmatpush1.msra.mxu0 %v292_v62  ;;  %v615_v0 = vrot.slane %v1628_v56, %v2024_v20 }
  0xd2   : > { %v290_v14 = vmul.f32 %v2181_v48, %v267_v3  ;;  %v291_v15 = vmul.f32 %v2184_v51, %v263_v2 }
  0xd3   : > { %v252_v17 = vpop.permute.xlu1 %251 }
  0xd4   : > { %v244_v21 = vpop.permute.xlu0 %243  ;;  %983 = vmatprep.subr.mxu0 %v291_v15 }
  0xd5   : > { %v262_v22 = vsel %vm261_vm4, %v244_v21, %v252_v17  ;;  %v266_v23 = vsel %vm261_vm4, %v252_v17, %v244_v21  ;;  %984 = vmatpush1.msra.mxu0 %v290_v14 }
  0xd6   : > { %v288_v26 = vmul.f32 %v2181_v48, %v266_v23  ;;  %v289_v29 = vmul.f32 %v2184_v51, %v262_v22 }
  0xd7   : > { %v653_v6 = vpop.permute.xlu1 %652 }
  0xd8   : > { %v645_v32 = vpop.permute.xlu0 %644  ;;  %985 = vmatprep.subr.mxu0 %v289_v29 }
  0xd9   : > { %v658_v33 = vsel %vm654_vm5, %v645_v32, %v653_v6  ;;  %v662_v34 = vsel %vm654_vm5, %v653_v6, %v645_v32  ;;  %986 = vmatpush1.msra.mxu0 %v288_v26 }
  0xda   : > { %v688_v35 = vmul.f32 %v2215_v30, %v658_v33  ;;  %v689_v36 = vmul.f32 %v2218_v31, %v662_v34 }
  0xdb   : > { %v651_v37 = vpop.permute.xlu1 %650 }
  0xdc   : > { %v643_v38 = vpop.permute.xlu0 %642  ;;  %987 = vmatprep.subr.mxu0 %v689_v36 }
  0xdd   : > { %v657_v39 = vsel %vm654_vm5, %v643_v38, %v651_v37  ;;  %v661_v7 = vsel %vm654_vm5, %v651_v37, %v643_v38  ;;  %988 = vmatpush2.msra.mxu0 %v688_v35  ;;  %v1627_v37 = vld [vmem:[%s2635_s1 + $0xa] sm:$0x3] }
  0xde   : > { %v686_v5 = vmul.f32 %v2215_v30, %v657_v39  ;;  %v687_v40 = vmul.f32 %v2218_v31, %v661_v7 }
  0xdf   : > { %v649_v41 = vpop.permute.xlu1 %648 }
  0xe0   : > { %v641_v42 = vpop.permute.xlu0 %640  ;;  %989 = vmatprep.subr.mxu0 %v687_v40  ;;  %v2289_v40 = vrot.slane %v1627_v37, %v2022_v19 }
  0xe1   : > { %v656_v43 = vsel %vm654_vm5, %v641_v42, %v649_v41  ;;  %v660_v44 = vsel %vm654_vm5, %v649_v41, %v641_v42  ;;  %990 = vmatpush2.msra.mxu0 %v686_v5  ;;  %v2292_v41 = vrot.slane %v1627_v37, %v2024_v20 }
  0xe2   : > { %v684_v8 = vmul.f32 %v2215_v30, %v656_v43  ;;  %v685_v9 = vmul.f32 %v2218_v31, %v660_v44 }
  0xe3   : > { %v647_v46 = vpop.permute.xlu1 %646 }
  0xe4   : > { %v639_v47 = vpop.permute.xlu0 %638  ;;  %991 = vmatprep.subr.mxu0 %v685_v9 }
  0xe5   : > { %v655_v10 = vsel %vm654_vm5, %v639_v47, %v647_v46  ;;  %v659_v11 = vsel %vm654_vm5, %v647_v46, %v639_v47  ;;  %992 = vmatpush2.msra.mxu0 %v684_v8 }
  0xe6   : > { %v682_v52 = vmul.f32 %v2215_v30, %v655_v10  ;;  %v683_v53 = vmul.f32 %v2218_v31, %v659_v11 }
  0xe7   : > { %v730_v57 = vpop.permute.xlu1 %729 }
  0xe8   : > { %v728_v58 = vpop.permute.xlu0 %727  ;;  %993 = vmatprep.subr.mxu0 %v683_v53 }
  0xe9   : > { %v731_v59 = vsel %vm718_vm6, %v728_v58, %v730_v57  ;;  %v732_v60 = vsel %vm718_vm6, %v730_v57, %v728_v58  ;;  %994 = vmatpush2.msra.mxu0 %v682_v52 }
  0xea   : > { %v762_v61 = vmul.f32 %v2249_v54, %v731_v59  ;;  %v763_v62 = vmul.f32 %v2252_v55, %v732_v60 }
  0xeb   : > { %v589_v1 = vpop.permute.xlu1 %588 }
  0xec   : > { %v581_v2 = vpop.permute.xlu0 %580  ;;  %1122 = vmatprep.subr.mxu1 %v763_v62 }
  0xed   : > { %v594_v3 = vsel %vm590_vm7, %v581_v2, %v589_v1  ;;  %v598_v14 = vsel %vm590_vm7, %v589_v1, %v581_v2  ;;  %1123 = vmatpush1.msra.mxu1 %v762_v61 }
  0xee   : > { %v624_v15 = vmul.f32 %v611_v63, %v594_v3  ;;  %v625_v16 = vmul.f32 %v615_v0, %v598_v14 }
  0xef   : > { %v666_v17 = vpop.permute.xlu1 %665 }
  0xf0   : > { %v664_v21 = vpop.permute.xlu0 %663  ;;  %995 = vmatprep.subr.mxu0 %v625_v16 }
  0xf1   : > { %v667_v22 = vsel %vm654_vm5, %v664_v21, %v666_v17  ;;  %v668_v23 = vsel %vm654_vm5, %v666_v17, %v664_v21  ;;  %996 = vmatpush2.msra.mxu0 %v624_v15 }
  0xf2   : > { %v698_v26 = vmul.f32 %v2215_v30, %v667_v22  ;;  %v699_v29 = vmul.f32 %v2218_v31, %v668_v23 }
  0xf3   : > { %v587_v6 = vpop.permute.xlu1 %586 }
  0xf4   : > { %v579_v32 = vpop.permute.xlu0 %578  ;;  %1124 = vmatprep.subr.mxu1 %v699_v29 }
  0xf5   : > { %v593_v33 = vsel %vm590_vm7, %v579_v32, %v587_v6  ;;  %v597_v34 = vsel %vm590_vm7, %v587_v6, %v579_v32  ;;  %1125 = vmatpush1.msra.mxu1 %v698_v26 }
  0xf6   : > { %v622_v35 = vmul.f32 %v611_v63, %v593_v33  ;;  %v623_v36 = vmul.f32 %v615_v0, %v597_v34 }
  0xf7   : > { %v602_v38 = vpop.permute.xlu1 %601 }
  0xf8   : > { %v600_v30 = vpop.permute.xlu0 %599  ;;  %997 = vmatprep.subr.mxu0 %v623_v36 }
  0xf9   : > { %v603_v31 = vsel %vm590_vm7, %v600_v30, %v602_v38  ;;  %v604_v39 = vsel %vm590_vm7, %v602_v38, %v600_v30  ;;  %998 = vmatpush2.msra.mxu0 %v622_v35 }
  0xfa   : > { %v634_v7 = vmul.f32 %v611_v63, %v603_v31  ;;  %v635_v5 = vmul.f32 %v615_v0, %v604_v39 }
  0xfb   : > { %v538_v42 = vpop.permute.xlu1 %537 }
  0xfc   : > { %v536_v43 = vpop.permute.xlu0 %535  ;;  %1126 = vmatprep.subr.mxu1 %v635_v5 }
  0xfd   : > { %v539_v44 = vsel %vm526_vm8, %v536_v43, %v538_v42  ;;  %v540_v8 = vsel %vm526_vm8, %v538_v42, %v536_v43  ;;  %1127 = vmatpush1.msra.mxu1 %v634_v7 }
  0xfe   : > { %v570_v9 = vmul.f32 %v2289_v40, %v539_v44  ;;  %v571_v45 = vmul.f32 %v2292_v41, %v540_v8 }
  0xff   : > { %v585_v46 = vpop.permute.xlu1 %584 }
 0x100   : > { %v577_v19 = vpop.permute.xlu0 %576  ;;  %1128 = vmatprep.subr.mxu1 %v571_v45 }
 0x101   : > { %v592_v20 = vsel %vm590_vm7, %v577_v19, %v585_v46  ;;  %v596_v47 = vsel %vm590_vm7, %v585_v46, %v577_v19  ;;  %1129 = vmatpush1.msra.mxu1 %v570_v9 }
 0x102   : > { %v620_v10 = vmul.f32 %v611_v63, %v592_v20  ;;  %v621_v11 = vmul.f32 %v615_v0, %v596_v47  ;;  %1130 = vmatprep.subr.mxu1 %v1921_v12 }
 0x103   : > { %1131 = vmatpush1.msra.mxu1 %v1926_v13  ;;  %v583_v52 = vpop.permute.xlu1 %582 }
 0x104   : > { %v575_v53 = vpop.permute.xlu0 %574  ;;  %999 = vmatprep.subr.mxu0 %v621_v11  ;;  %v853_v11 = vld [vmem:[#allocation2 + $0x298] sm:$0xff] }
 0x105   : > { %v591_v56 = vsel %vm590_vm7, %v575_v53, %v583_v52  ;;  %v595_v57 = vsel %vm590_vm7, %v583_v52, %v575_v53  ;;  %1000 = vmatpush2.msra.mxu0 %v620_v10 }
 0x106   : > { %v618_v58 = vmul.f32 %v611_v63, %v591_v56  ;;  %v619_v59 = vmul.f32 %v615_v0, %v595_v57  ;;  %v851_v56 = vld [vmem:[#allocation2 + $0x290] sm:$0xff] }
 0x107   : > { %v464_v60 = vpop.permute.xlu1 %463 }
 0x108   : > { %v462_v61 = vpop.permute.xlu0 %461  ;;  %1001 = vmatprep.subr.mxu0 %v619_v59  ;;  %v849_v59 = vld [vmem:[#allocation2 + $0x210] sm:$0xff] }
 0x109   : > { %v465_v12 = vsel %vm452_vm1, %v462_v61, %v464_v60  ;;  %v466_v13 = vsel %vm452_vm1, %v464_v60, %v462_v61  ;;  %1002 = vmatpush2.msra.mxu0 %v618_v58  ;;  %v848_v61 = vld [vmem:[#allocation2 + $0x258] sm:$0xff] }
 0x10a   : > { %v496_v62 = vmul.f32 %v2035_v24, %v466_v13  ;;  %v497_v1 = vmul.f32 %v2038_v25, %v465_v12 }
 0x10b   : > { %v525_v2 = vpop.permute.xlu1 %524 }
 0x10c   : > { %v517_v3 = vpop.permute.xlu0 %516  ;;  %1132 = vmatprep.subr.mxu1 %v497_v1 }
 0x10d   : > { %v530_v63 = vsel %vm526_vm8, %v517_v3, %v525_v2  ;;  %v534_v0 = vsel %vm526_vm8, %v525_v2, %v517_v3  ;;  %1133 = vmatpush1.msra.mxu1 %v496_v62  ;;  %v847_v62 = vld [vmem:[#allocation2 + $0x150] sm:$0xff]  ;;  %v846_v3 = vld [vmem:[#allocation2 + $0xc0] sm:$0xff] }
 0x10e   : > { %v560_v14 = vmul.f32 %v2289_v40, %v530_v63  ;;  %v561_v15 = vmul.f32 %v2292_v41, %v534_v0  ;;  %v766_v0 = vld [vmem:[%s2636_s2] sm:$0xff] }
 0x10f   : > { %v400_v16 = vpop.permute.xlu1 %399 }
 0x110   : > { %1003 = vmatprep.subr.mxu0 %v561_v15  ;;  %v398_v17 = vpop.permute.xlu0 %397  ;;  %v770_v15 = vld [vmem:[%s2636_s2 + $0x20] sm:$0xff] }
 0x111   : > { %1004 = vmatpush2.msra.mxu0 %v560_v14  ;;  %v401_v24 = vsel %vm388_vm2, %v398_v17, %v400_v16  ;;  %v402_v25 = vsel %vm388_vm2, %v400_v16, %v398_v17 }
 0x112   : > { %v432_v21 = vmul.f32 %v2079_v49, %v402_v25  ;;  %v433_v22 = vmul.f32 %v2082_v50, %v401_v24 }
 0x113   : > { %v523_v23 = vpop.permute.xlu1 %522 }
 0x114   : > { %v515_v26 = vpop.permute.xlu0 %514  ;;  %1134 = vmatprep.subr.mxu1 %v433_v22  ;;  %v769_v22 = vld [vmem:[%s2636_s2 + $0x18] sm:$0xff] }
 0x115   : > { %v529_v29 = vsel %vm526_vm8, %v515_v26, %v523_v23  ;;  %v533_v6 = vsel %vm526_vm8, %v523_v23, %v515_v26  ;;  %1135 = vmatpush1.msra.mxu1 %v432_v21  ;;  %v773_v26 = vld [vmem:[%s2636_s2 + $0x38] sm:$0xff] }
 0x116   : > { %v558_v32 = vmul.f32 %v2289_v40, %v529_v29  ;;  %v559_v33 = vmul.f32 %v2292_v41, %v533_v6 }
 0x117   : > { %v336_v34 = vpop.permute.xlu1 %335 }
 0x118   : > { %v334_v35 = vpop.permute.xlu0 %333  ;;  %1005 = vmatprep.subr.mxu0 %v559_v33 }
 0x119   : > { %v337_v49 = vsel %vm324_vm3, %v334_v35, %v336_v34  ;;  %v338_v50 = vsel %vm324_vm3, %v336_v34, %v334_v35  ;;  %1006 = vmatpush2.msra.mxu0 %v558_v32  ;;  %v768_v34 = vld [vmem:[%s2636_s2 + $0x10] sm:$0xff] }
 0x11a   : > { %v368_v36 = vmul.f32 %v2129_v27, %v338_v50  ;;  %v369_v37 = vmul.f32 %v2132_v28, %v337_v49  ;;  %v772_v35 = vld [vmem:[%s2636_s2 + $0x30] sm:$0xff]  ;;  %v779_v49 = vld [vmem:[%s2636_s2 + $0x68] sm:$0xff]  ;;  %v774_v50 = vld [vmem:[%s2636_s2 + $0x40] sm:$0xff] }
 0x11b   : > { %v521_v38 = vpop.permute.xlu1 %520 }
 0x11c   : > { %v513_v30 = vpop.permute.xlu0 %512  ;;  %1136 = vmatprep.subr.mxu1 %v369_v37  ;;  %v782_v37 = vld [vmem:[%s2636_s2 + $0x80] sm:$0xff] }
 0x11d   : > { %v528_v31 = vsel %vm526_vm8, %v513_v30, %v521_v38  ;;  %v532_v39 = vsel %vm526_vm8, %v521_v38, %v513_v30  ;;  %1137 = vmatpush1.msra.mxu1 %v368_v36  ;;  %v778_v36 = vld [vmem:[%s2636_s2 + $0x60] sm:$0xff]  ;;  %v777_v38 = vld [vmem:[%s2636_s2 + $0x58] sm:$0xff] }
 0x11e   : > { %v556_v7 = vmul.f32 %v2289_v40, %v528_v31  ;;  %v557_v5 = vmul.f32 %v2292_v41, %v532_v39  ;;  %v781_v30 = vld [vmem:[%s2636_s2 + $0x78] sm:$0xff]  ;;  %v780_v39 = vld [vmem:[%s2636_s2 + $0x70] sm:$0xff] }
 0x11f   : > { %v273_v42 = vpop.permute.xlu1 %272  ;;  %v785_v31 = vld [vmem:[%s2636_s2 + $0x98] sm:$0xff] }
 0x120   : > { %v271_v43 = vpop.permute.xlu0 %270  ;;  %1007 = vmatprep.subr.mxu0 %v557_v5  ;;  %v788_v5 = vld [vmem:[%s2636_s2 + $0xb0] sm:$0xff] }
 0x121   : > { %v274_v27 = vsel %vm261_vm4, %v271_v43, %v273_v42  ;;  %v275_v28 = vsel %vm261_vm4, %v273_v42, %v271_v43  ;;  %1008 = vmatpush2.msra.mxu0 %v556_v7  ;;  %v784_v7 = vld [vmem:[%s2636_s2 + $0x90] sm:$0xff]  ;;  %v783_v42 = vld [vmem:[%s2636_s2 + $0x88] sm:$0xff] }
 0x122   : > { %v304_v44 = vmul.f32 %v2181_v48, %v275_v28  ;;  %v305_v8 = vmul.f32 %v2184_v51, %v274_v27  ;;  %v852_v48 = vld [vmem:[#allocation2 + $0x238] sm:$0xff]  ;;  %v787_v43 = vld [vmem:[%s2636_s2 + $0xa8] sm:$0xff]  ;;  %v786_v28 = vld [vmem:[%s2636_s2 + $0xa0] sm:$0xff] }
 0x123   : > { %v519_v9 = vpop.permute.xlu1 %518  ;;  %v791_v27 = vld [vmem:[%s2636_s2 + $0xc8] sm:$0xff] }
 0x124   : > { %v511_v45 = vpop.permute.xlu0 %510  ;;  %1138 = vmatprep.subr.mxu1 %v305_v8  ;;  %v794_v8 = vld [vmem:[%s2636_s2 + $0xe0] sm:$0xff] }
 0x125   : > { %v527_v46 = vsel %vm526_vm8, %v511_v45, %v519_v9  ;;  %v531_v19 = vsel %vm526_vm8, %v519_v9, %v511_v45  ;;  %1139 = vmatpush1.msra.mxu1 %v304_v44  ;;  %v790_v44 = vld [vmem:[%s2636_s2 + $0xc0] sm:$0xff]  ;;  %v789_v9 = vld [vmem:[%s2636_s2 + $0xb8] sm:$0xff] }
 0x126   : > { %v554_v20 = vmul.f32 %v2289_v40, %v527_v46  ;;  %v555_v47 = vmul.f32 %v2292_v41, %v531_v19  ;;  %v850_v40 = vld [vmem:[#allocation2 + $0x1a0] sm:$0xff]  ;;  %v793_v45 = vld [vmem:[%s2636_s2 + $0xd8] sm:$0xff]  ;;  %v792_v19 = vld [vmem:[%s2636_s2 + $0xd0] sm:$0xff] }
 0x127   : > { %v717_v10 = vpop.permute.xlu1 %716  ;;  %v797_v46 = vld [vmem:[%s2636_s2 + $0xf8] sm:$0xff] }
 0x128   : > { %v709_v52 = vpop.permute.xlu0 %708  ;;  %1009 = vmatprep.subr.mxu0 %v555_v47  ;;  %v800_v47 = vld [vmem:[%s2636_s2 + $0x110] sm:$0xff] }
 0x129   : > { %v722_v51 = vsel %vm718_vm6, %v709_v52, %v717_v10  ;;  %v726_v53 = vsel %vm718_vm6, %v717_v10, %v709_v52  ;;  %1010 = vmatpush2.msra.mxu0 %v554_v20  ;;  %v796_v20 = vld [vmem:[%s2636_s2 + $0xf0] sm:$0xff]  ;;  %v795_v10 = vld [vmem:[%s2636_s2 + $0xe8] sm:$0xff] }
 0x12a   : > { %v752_v57 = vmul.f32 %v2249_v54, %v722_v51  ;;  %v753_v58 = vmul.f32 %v2252_v55, %v726_v53  ;;  %1011 = vmatprep.subr.mxu0 %v853_v11  ;;  %v799_v11 = vld [vmem:[%s2636_s2 + $0x108] sm:$0xff]  ;;  %v802_v51 = vld [vmem:[%s2636_s2 + $0x120] sm:$0xff] }
 0x12b   : > { %v715_v41 = vpop.permute.xlu1 %714  ;;  %1012 = vmatpush2.msra.mxu0 %v852_v48  ;;  %v803_v52 = vld [vmem:[%s2636_s2 + $0x128] sm:$0xff]  ;;  %v798_v48 = vld [vmem:[%s2636_s2 + $0x100] sm:$0xff] }
 0x12c   : > { %v707_v60 = vpop.permute.xlu0 %706  ;;  %1140 = vmatprep.subr.mxu1 %v753_v58  ;;  %1013 = vmatprep.subr.mxu0 %v851_v56  ;;  %v806_v53 = vld [vmem:[%s2636_s2 + $0x140] sm:$0xff]  ;;  %v801_v56 = vld [vmem:[%s2636_s2 + $0x118] sm:$0xff] }
 0x12d   : > { %v721_v12 = vsel %vm718_vm6, %v707_v60, %v715_v41  ;;  %v725_v13 = vsel %vm718_vm6, %v715_v41, %v707_v60  ;;  %1141 = vmatpush1.msra.mxu1 %v752_v57  ;;  %1014 = vmatpush2.msra.mxu0 %v850_v40  ;;  %v805_v57 = vld [vmem:[%s2636_s2 + $0x138] sm:$0xff]  ;;  %v804_v40 = vld [vmem:[%s2636_s2 + $0x130] sm:$0xff]  ;;  %v807_v60 = vld [vmem:[%s2636_s2 + $0x148] sm:$0xff] }
 0x12e   : > { %v750_v1 = vmul.f32 %v2249_v54, %v721_v12  ;;  %v751_v2 = vmul.f32 %v2252_v55, %v725_v13  ;;  %1015 = vmatprep.subr.mxu0 %v849_v59  ;;  %v809_v58 = vld [vmem:[%s2636_s2 + $0x158] sm:$0xff]  ;;  %v808_v41 = vld [vmem:[%s2636_s2 + $0x150] sm:$0xff]  ;;  %v810_v12 = vld [vmem:[%s2636_s2 + $0x160] sm:$0xff] }
 0x12f   : > { %v713_v63 = vpop.permute.xlu1 %712  ;;  %1016 = vmatpush2.msra.mxu0 %v848_v61  ;;  %v812_v59 = vld [vmem:[%s2636_s2 + $0x170] sm:$0xff]  ;;  %v811_v61 = vld [vmem:[%s2636_s2 + $0x168] sm:$0xff]  ;;  %v813_v13 = vld [vmem:[%s2636_s2 + $0x178] sm:$0xff] }
 0x130   : > { %v705_v14 = vpop.permute.xlu0 %704  ;;  %1142 = vmatprep.subr.mxu1 %v751_v2  ;;  %1017 = vmatprep.subr.mxu0 %v847_v62 }
 0x131   : > { %v720_v16 = vsel %vm718_vm6, %v705_v14, %v713_v63  ;;  %v724_v17 = vsel %vm718_vm6, %v713_v63, %v705_v14  ;;  %1143 = vmatpush1.msra.mxu1 %v750_v1  ;;  %1018 = vmatpush2.msra.mxu0 %v846_v3 }
 0x132   : > { %v748_v24 = vmul.f32 %v2249_v54, %v720_v16  ;;  %v749_v25 = vmul.f32 %v2252_v55, %v724_v17  ;;  %1020 = vmatmul.mubr.f32.vlgmr.msra.gmra.mxu0 %v766_v0 }
 0x133   : > { %v711_v21 = vpop.permute.xlu1 %710  ;;  %1025 = vmatprep.mubr.f32.mxu0 %v770_v15 }
 0x134   : > { %v703_v23 = vpop.permute.xlu0 %702  ;;  %1144 = vmatprep.subr.mxu1 %v749_v25 }
 0x135   : > { %v719_v29 = vsel %vm718_vm6, %v703_v23, %v711_v21  ;;  %v723_v6 = vsel %vm718_vm6, %v711_v21, %v703_v23  ;;  %1145 = vmatpush1.msra.mxu1 %v748_v24 }
 0x136   : > { %v746_v32 = vmul.f32 %v2249_v54, %v719_v29  ;;  %v747_v33 = vmul.f32 %v2252_v55, %v723_v6  ;;  %1026 = vmatmul.mubr.f32.gmra.mxu0 %v769_v22  ;;  %v771_v54 = vld [vmem:[%s2636_s2 + $0x28] sm:$0xff] }
 0x137   : > { %1031 = vmatprep.mubr.f32.mxu0 %v773_v26  ;;  %v775_v55 = vld [vmem:[%s2636_s2 + $0x48] sm:$0xff] }
 0x138   : > { %1146 = vmatprep.subr.mxu1 %v747_v33 }
 0x139   : > { %1147 = vmatpush1.msra.mxu1 %v746_v32 }
 0x13a   : > { %1631 = vmatmul.mubr.msk.f32.vlgmr.msra.gmra.mxu1 %vm906_vm9, %v768_v34  ;;  %1032 = vmatmul.mubr.f32.gmra.mxu0 %v772_v35 }
 0x13b   : > { %1186 = vmatprep.mubr.f32.mxu1 %v1828_v4  ;;  %1037 = vmatprep.mubr.f32.mxu0 %v776_v18 }
 0x13e   : > { %1632 = vmatmul.mubr.msk.f32.gmra.mxu1 %vm906_vm9, %v771_v54  ;;  %1038 = vmatmul.mubr.f32.gmra.mxu0 %v775_v55 }
 0x13f   : > { %1192 = vmatprep.mubr.f32.mxu1 %v1828_v4  ;;  %1043 = vmatprep.mubr.f32.mxu0 %v779_v49 }
 0x142   : > { %1633 = vmatmul.mubr.msk.f32.gmra.mxu1 %vm906_vm9, %v774_v50  ;;  %1044 = vmatmul.mubr.f32.gmra.mxu0 %v778_v36 }
 0x143   : > { %1198 = vmatprep.mubr.f32.mxu1 %v1828_v4  ;;  %1049 = vmatprep.mubr.f32.mxu0 %v782_v37 }
 0x146   : > { %1634 = vmatmul.mubr.msk.f32.gmra.mxu1 %vm906_vm9, %v777_v38  ;;  %1050 = vmatmul.mubr.f32.gmra.mxu0 %v781_v30 }
 0x147   : > { %1204 = vmatprep.mubr.f32.mxu1 %v1828_v4  ;;  %1055 = vmatprep.mubr.f32.mxu0 %v785_v31 }
 0x14a   : > { %1635 = vmatmul.mubr.msk.f32.gmra.mxu1 %vm906_vm9, %v780_v39  ;;  %1056 = vmatmul.mubr.f32.gmra.mxu0 %v784_v7 }
 0x14b   : > { %1210 = vmatprep.mubr.f32.mxu1 %v1828_v4  ;;  %1061 = vmatprep.mubr.f32.mxu0 %v788_v5 }
 0x14e   : > { %1636 = vmatmul.mubr.msk.f32.gmra.mxu1 %vm906_vm9, %v783_v42  ;;  %1062 = vmatmul.mubr.f32.gmra.mxu0 %v787_v43 }
 0x14f   : > { %1216 = vmatprep.mubr.f32.mxu1 %v1828_v4  ;;  %1067 = vmatprep.mubr.f32.mxu0 %v791_v27 }
 0x152   : > { %1637 = vmatmul.mubr.msk.f32.gmra.mxu1 %vm906_vm9, %v786_v28  ;;  %1068 = vmatmul.mubr.f32.gmra.mxu0 %v790_v44 }
 0x153   : > { %1222 = vmatprep.mubr.f32.mxu1 %v1828_v4  ;;  %1073 = vmatprep.mubr.f32.mxu0 %v794_v8 }
 0x156   : > { %1638 = vmatmul.mubr.msk.f32.gmra.mxu1 %vm906_vm9, %v789_v9  ;;  %1074 = vmatmul.mubr.f32.gmra.mxu0 %v793_v45 }
 0x157   : > { %1228 = vmatprep.mubr.f32.mxu1 %v1828_v4  ;;  %1079 = vmatprep.mubr.f32.mxu0 %v797_v46 }
 0x15a   : > { %1639 = vmatmul.mubr.msk.f32.gmra.mxu1 %vm906_vm9, %v792_v19  ;;  %1080 = vmatmul.mubr.f32.gmra.mxu0 %v796_v20 }
 0x15b   : > { %1234 = vmatprep.mubr.f32.mxu1 %v1828_v4  ;;  %1085 = vmatprep.mubr.f32.mxu0 %v800_v47 }
 0x15e   : > { %1640 = vmatmul.mubr.msk.f32.gmra.mxu1 %vm906_vm9, %v795_v10  ;;  %1086 = vmatmul.mubr.f32.gmra.mxu0 %v799_v11 }
 0x15f   : > { %1240 = vmatprep.mubr.f32.mxu1 %v1828_v4  ;;  %1091 = vmatprep.mubr.f32.mxu0 %v803_v52 }
 0x162   : > { %1641 = vmatmul.mubr.msk.f32.gmra.mxu1 %vm906_vm9, %v798_v48  ;;  %1092 = vmatmul.mubr.f32.gmra.mxu0 %v802_v51 }
 0x163   : > { %1246 = vmatprep.mubr.f32.mxu1 %v1828_v4  ;;  %1097 = vmatprep.mubr.f32.mxu0 %v806_v53 }
 0x166   : > { %1642 = vmatmul.mubr.msk.f32.gmra.mxu1 %vm906_vm9, %v801_v56  ;;  %1098 = vmatmul.mubr.f32.gmra.mxu0 %v805_v57 }
 0x167   : > { %1252 = vmatprep.mubr.f32.mxu1 %v1828_v4  ;;  %1103 = vmatprep.mubr.f32.mxu0 %v809_v58 }
 0x16a   : > { %1643 = vmatmul.mubr.msk.f32.gmra.mxu1 %vm906_vm9, %v804_v40  ;;  %1104 = vmatmul.mubr.f32.gmra.mxu0 %v808_v41 }
 0x16b   : > { %1258 = vmatprep.mubr.f32.mxu1 %v1828_v4  ;;  %1109 = vmatprep.mubr.f32.mxu0 %v812_v59 }
 0x16e   : > { %1644 = vmatmul.mubr.msk.f32.gmra.mxu1 %vm906_vm9, %v807_v60  ;;  %1110 = vmatmul.mubr.f32.gmra.mxu0 %v811_v61 }
 0x16f   : > { %1264 = vmatprep.mubr.f32.mxu1 %v1828_v4 }
 0x172   : > { %1645 = vmatmul.mubr.msk.f32.gmra.mxu1 %vm906_vm9, %v810_v12 }
 0x173   : > { %1270 = vmatprep.mubr.f32.mxu1 %v1828_v4 }
 0x176   : > { %1646 = vmatmul.mubr.msk.f32.gmra.mxu1 %vm906_vm9, %v813_v13 }
 0x1f2   : > { %v1021_v62 = vpop.f32.mrf.mxu0 }
 0x1f4   : > { %v1023_v1 = vpop.f32.mrf.mxu0 }
 0x1f6   : > { %v1027_v2 = vpop.f32.mrf.mxu0 }
 0x1f8   : > { %v1029_v3 = vpop.f32.mrf.mxu0 }
 0x1fa   : > { %v1182_v63 = vpop.f32.mrf.mxu1  ;;  %v1033_v0 = vpop.f32.mrf.mxu0 }
 0x1fb   : > { %v1183_v31 = vadd.f32 %v1182_v63, %v1021_v62 }
 0x1fc   : > { %v1184_v14 = vpop.f32.mrf.mxu1  ;;  %v1035_v15 = vpop.f32.mrf.mxu0 }
 0x1fd   : > { %v1185_v39 = vadd.f32 %v1184_v14, %v1023_v1  ;;  %v1311_v44 = vmul.f32 0.5, %v1183_v31 }
 0x1fe   : > { %v1188_v16 = vpop.f32.mrf.mxu1  ;;  %v1039_v17 = vpop.f32.mrf.mxu0 }
 0x1ff   : > { %v1189_v42 = vadd.f32 %v1188_v16, %v1027_v2  ;;  %v1312_v8 = vmul.f32 0.5, %v1185_v39  ;;  %1699 = vtanh.f32 %v1311_v44 }
 0x200   : > { %v1190_v24 = vpop.f32.mrf.mxu1  ;;  %v1041_v25 = vpop.f32.mrf.mxu0 }
 0x201   : > { %v1191_v43 = vadd.f32 %v1190_v24, %v1029_v3  ;;  %v1363_v19 = vmul.f32 0.5, %v1189_v42  ;;  %1701 = vtanh.f32 %v1312_v8 }
 0x202   : > { %v1194_v21 = vpop.f32.mrf.mxu1  ;;  %v1045_v4 = vpop.f32.mrf.mxu0 }
 0x203   : > { %v1195_v9 = vadd.f32 %v1194_v21, %v1033_v0  ;;  %v1364_v47 = vmul.f32 0.5, %v1191_v43  ;;  %1703 = vtanh.f32 %v1363_v19 }
 0x204   : > { %v1196_v22 = vpop.f32.mrf.mxu1  ;;  %v1047_v23 = vpop.f32.mrf.mxu0 }
 0x205   : > { %v1415_v51 = vmul.f32 0.5, %v1195_v9  ;;  %v1197_v57 = vadd.f32 %v1196_v22, %v1035_v15  ;;  %1705 = vtanh.f32 %v1364_v47 }
 0x206   : > { %v1200_v26 = vpop.f32.mrf.mxu1  ;;  %v1051_v29 = vpop.f32.mrf.mxu0 }
 0x207   : > { %v1201_v61 = vadd.f32 %v1200_v26, %v1039_v17  ;;  %1707 = vtanh.f32 %v1415_v51  ;;  %v1416_v2 = vmul.f32 0.5, %v1197_v57 }
 0x208   : > { %v1202_v6 = vpop.f32.mrf.mxu1  ;;  %v1053_v32 = vpop.f32.mrf.mxu0 }
 0x209   : > { %v1203_v3 = vadd.f32 %v1202_v6, %v1041_v25  ;;  %v1467_v16 = vmul.f32 0.5, %v1201_v61 }
 0x20a   : > { %v1206_v33 = vpop.f32.mrf.mxu1  ;;  %v1057_v34 = vpop.f32.mrf.mxu0 }
 0x20b   : > { %v1207_v20 = vadd.f32 %v1206_v33, %v1045_v4  ;;  %v1468_v22 = vmul.f32 0.5, %v1203_v3 }
 0x20c   : > { %v1208_v35 = vpop.f32.mrf.mxu1  ;;  %v1059_v18 = vpop.f32.mrf.mxu0 }
 0x20d   : > { %v1209_v10 = vadd.f32 %v1208_v35, %v1047_v23  ;;  %v1321_v58 = vmul.f32 0.5, %v1207_v20 }
 0x20e   : > { %v1212_v54 = vpop.f32.mrf.mxu1  ;;  %v1063_v55 = vpop.f32.mrf.mxu0 }
 0x20f   : > { %v1213_v48 = vadd.f32 %v1212_v54, %v1051_v29  ;;  %v1322_v40 = vmul.f32 0.5, %v1209_v10  ;;  %1709 = vtanh.f32 %v1321_v58 }
 0x210   : > { %v1214_v49 = vpop.f32.mrf.mxu1  ;;  %v1065_v50 = vpop.f32.mrf.mxu0 }
 0x211   : > { %v1215_v41 = vadd.f32 %v1214_v49, %v1053_v32  ;;  %v1373_v12 = vmul.f32 0.5, %v1213_v48  ;;  %1711 = vtanh.f32 %v1322_v40  ;;  %v1700_v32 = vpop.eup %1699 }
 0x212   : > { %v1218_v36 = vpop.f32.mrf.mxu1  ;;  %v2554_v37 = vpop.f32.mrf.mxu0 }
 0x213   : > { %v1219_v13 = vadd.f32 %v1218_v36, %v1057_v34  ;;  %v1374_v63 = vmul.f32 0.5, %v1215_v41  ;;  %1713 = vtanh.f32 %v1373_v12  ;;  %v1702_v34 = vpop.eup %1701 }
 0x214   : > { %v1220_v38 = vpop.f32.mrf.mxu1  ;;  %v2556_v30 = vpop.f32.mrf.mxu0  ;;  %1715 = vtanh.f32 %v1416_v2  ;;  %v1316_v42 = vmul.f32 0.5, %v1702_v34 }
 0x215   : > { %v1221_v0 = vadd.f32 %v1220_v38, %v1059_v18  ;;  %v1425_v21 = vmul.f32 0.5, %v1219_v13  ;;  %1717 = vtanh.f32 %v1374_v63  ;;  %v1704_v18 = vpop.eup %1703 }
 0x216   : > { %v1224_v7 = vpop.f32.mrf.mxu1  ;;  %v2558_v5 = vpop.f32.mrf.mxu0  ;;  %1719 = vtanh.f32 %v1467_v16  ;;  %v1367_v44 = vmul.f32 0.5, %v1704_v18  ;;  %v1318_v40 = vadd.f32 0.5, %v1316_v42 }
 0x217   : > { %v1225_v24 = vadd.f32 %v1224_v7, %v1063_v55  ;;  %v1426_v23 = vmul.f32 0.5, %v1221_v0  ;;  %1721 = vtanh.f32 %v1425_v21  ;;  %v1706_v36 = vpop.eup %1705 }
 0x218   : > { %v1226_v27 = vpop.f32.mrf.mxu1  ;;  %v2560_v28 = vpop.f32.mrf.mxu0  ;;  %1723 = vtanh.f32 %v1468_v22  ;;  %v1368_v8 = vmul.f32 0.5, %v1706_v36  ;;  %v2592_v13 = vadd.f32 0.5, %v1367_v44  ;;  %v1395_v36 = vld [vmem:[#allocation5 + $0x20] sm:$0xff] }
 0x219   : > { %v1227_v26 = vadd.f32 %v1226_v27, %v1065_v50  ;;  %v1477_v6 = vmul.f32 0.5, %v1225_v24  ;;  %1725 = vtanh.f32 %v1426_v23  ;;  %v1315_v50 = vmul.f32 0.5, %v1700_v32  ;;  %v1708_v7 = vpop.eup %1707 }
 0x21a   : > { %v2562_v45 = vpop.f32.mrf.mxu1  ;;  %v2564_v46 = vpop.f32.mrf.mxu0 }
 0x21b   : > { %v1478_v54 = vmul.f32 0.5, %v1227_v26  ;;  %1727 = vtanh.f32 %v1477_v6  ;;  %v1231_v31 = vadd.f32 %v2562_v45, %v2554_v37  ;;  %v1317_v37 = vadd.f32 0.5, %v1315_v50 }
 0x21c   : > { %v2566_v11 = vpop.f32.mrf.mxu1  ;;  %v2568_v52 = vpop.f32.mrf.mxu0  ;;  %v1419_v45 = vmul.f32 0.5, %v1708_v7 }
 0x21d   : > { %v1710_v27 = vpop.eup %1709  ;;  %v1233_v9 = vadd.f32 %v2566_v11, %v2556_v30  ;;  %v1331_v51 = vmul.f32 0.5, %v1231_v31  ;;  %v2594_v30 = vadd.f32 0.5, %v1368_v8 }
 0x21e   : > { %v2570_v53 = vpop.f32.mrf.mxu1  ;;  %v2572_v56 = vpop.f32.mrf.mxu0  ;;  %v1325_v41 = vmul.f32 0.5, %v1710_v27  ;;  %v2598_v16 = vadd.f32 0.5, %v1419_v45 }
 0x21f   : > { %v1712_v47 = vpop.eup %1711  ;;  %v1237_v57 = vadd.f32 %v2570_v53, %v2558_v5 }
 0x220   : > { %v2574_v59 = vpop.f32.mrf.mxu1  ;;  %v2576_v60 = vpop.f32.mrf.mxu0  ;;  %v1326_v11 = vmul.f32 0.5, %v1712_v47  ;;  %v1327_v23 = vadd.f32 0.5, %v1325_v41 }
 0x221   : > { %v1714_v48 = vpop.eup %1713  ;;  %v1383_v24 = vmul.f32 0.5, %v1237_v57 }
 0x222   : > { %v2578_v62 = vpop.f32.mrf.mxu1  ;;  %v1093_v1 = vpop.f32.mrf.mxu0  ;;  %v1377_v0 = vmul.f32 0.5, %v1714_v48  ;;  %v1328_v32 = vadd.f32 0.5, %v1326_v11 }
 0x223   : > { %v1716_v12 = vpop.eup %1715  ;;  %v1243_v21 = vadd.f32 %v2578_v62, %v2564_v46 }
 0x224   : > { %v2580_v14 = vpop.f32.mrf.mxu1  ;;  %v1095_v15 = vpop.f32.mrf.mxu0 }
 0x225   : > { %v1718_v63 = vpop.eup %1717  ;;  %v1245_v26 = vadd.f32 %v2580_v14, %v2568_v52  ;;  %v1435_v52 = vmul.f32 0.5, %v1243_v21 }
 0x226   : > { %v2582_v17 = vpop.f32.mrf.mxu1  ;;  %v1099_v4 = vpop.f32.mrf.mxu0 }
 0x227   : > { %v1720_v53 = vpop.eup %1719  ;;  %v1249_v14 = vadd.f32 %v2582_v17, %v2572_v56  ;;  %v1436_v7 = vmul.f32 0.5, %v1245_v26  ;;  %v1500_v26 = vld [vmem:[#allocation5 + $0x28] sm:$0xff] }
 0x228   : > { %v2584_v25 = vpop.f32.mrf.mxu1  ;;  %v1101_v29 = vpop.f32.mrf.mxu0  ;;  %v1471_v31 = vmul.f32 0.5, %v1720_v53 }
 0x229   : > { %v1722_v22 = vpop.eup %1721  ;;  %v1251_v44 = vadd.f32 %v2584_v25, %v2576_v60  ;;  %v1487_v17 = vmul.f32 0.5, %v1249_v14 }
 0x22a   : > { %v1254_v33 = vpop.f32.mrf.mxu1  ;;  %v1105_v49 = vpop.f32.mrf.mxu0  ;;  %v1473_v21 = vadd.f32 0.5, %v1471_v31 }
 0x22b   : > { %v1255_v35 = vadd.f32 %v1254_v33, %v1093_v1  ;;  %v1332_v1 = vmul.f32 0.5, %v1233_v9  ;;  %v1724_v6 = vpop.eup %1723  ;;  %v1378_v33 = vmul.f32 0.5, %v1718_v63 }
 0x22c   : > { %v1256_v55 = vpop.f32.mrf.mxu1  ;;  %v1107_v20 = vpop.f32.mrf.mxu0 }
 0x22d   : > { %v1257_v38 = vadd.f32 %v1256_v55, %v1095_v15  ;;  %1729 = vtanh.f32 %v1255_v35  ;;  %v1239_v15 = vadd.f32 %v2574_v59, %v2560_v28  ;;  %v1420_v28 = vmul.f32 0.5, %v1716_v12  ;;  %v1343_v59 = vld [vmem:[#allocation5] sm:$0xff]  ;;  %v1726_v18 = vpop.eup %1725 }
 0x22e   : > { %v1260_v39 = vpop.f32.mrf.mxu1  ;;  %v1111_v2 = vpop.f32.mrf.mxu0  ;;  %v1379_v55 = vadd.f32 0.5, %v1377_v0  ;;  %v1380_v27 = vadd.f32 0.5, %v1378_v33  ;;  %v1430_v47 = vmul.f32 0.5, %v1726_v18  ;;  %v1448_v0 = vld [vmem:[#allocation5 + $0x30] sm:$0xff] }
 0x22f   : > { %1731 = vtanh.f32 %v1257_v38  ;;  %v1261_v43 = vadd.f32 %v1260_v39, %v1099_v4  ;;  %v1384_v46 = vmul.f32 0.5, %v1239_v15  ;;  %v1429_v38 = vmul.f32 0.5, %v1722_v22 }
 0x230   : > { %1733 = vtanh.f32 %v1478_v54  ;;  %v1262_v19 = vpop.f32.mrf.mxu1  ;;  %v1113_v34 = vpop.f32.mrf.mxu0  ;;  %v1344_v54 = vld [vmem:[#allocation5 + $0x8] sm:$0xff]  ;;  %v1345_v39 = vmul.f32 %v1343_v59, %v1327_v23  ;;  %v1432_v12 = vadd.f32 0.5, %v1430_v47 }
 0x231   : > { %1735 = vtanh.f32 %v1261_v43  ;;  %v1263_v10 = vadd.f32 %v1262_v19, %v1101_v29  ;;  %v1346_v43 = vmul.f32 %v1344_v54, %v1328_v32  ;;  %v1397_v19 = vmul.f32 %v1395_v36, %v1379_v55 }
 0x232   : > { %v1266_v58 = vpop.f32.mrf.mxu1  ;;  %v1431_v56 = vadd.f32 0.5, %v1429_v38 }
 0x233   : > { %1737 = vtanh.f32 %v1263_v10  ;;  %v1267_v61 = vadd.f32 %v1266_v58, %v1105_v49  ;;  %v1728_v49 = vpop.eup %1727 }
 0x234   : > { %v1268_v3 = vpop.f32.mrf.mxu1  ;;  %v1481_v57 = vmul.f32 0.5, %v1728_v49 }
 0x235   : > { %1739 = vtanh.f32 %v1267_v61  ;;  %v1269_v5 = vadd.f32 %v1268_v3, %v1107_v20  ;;  %v1396_v20 = vld [vmem:[#allocation5 + $0x18] sm:$0xff]  ;;  %v1472_v3 = vmul.f32 0.5, %v1724_v6 }
 0x236   : > { %1741 = vtanh.f32 %v1331_v51  ;;  %v1272_v4 = vpop.f32.mrf.mxu1  ;;  %v1447_v51 = vld [vmem:[#allocation5 + $0x38] sm:$0xff]  ;;  %v1398_v60 = vmul.f32 %v1396_v20, %v1380_v27 }
 0x237   : > { %1743 = vtanh.f32 %v1269_v5  ;;  %v1273_v29 = vadd.f32 %v1272_v4, %v1111_v2  ;;  %v1422_v2 = vadd.f32 0.5, %v1420_v28  ;;  %v1449_v63 = vmul.f32 %v1447_v51, %v1431_v56  ;;  %v1499_v4 = vld [vmem:[#allocation5 + $0x10] sm:$0xff] }
 0x238   : > { %1745 = vtanh.f32 %v1332_v1  ;;  %v1274_v35 = vpop.f32.mrf.mxu1  ;;  %v1474_v59 = vadd.f32 0.5, %v1472_v3 }
 0x239   : > { %1747 = vtanh.f32 %v1273_v29  ;;  %v1275_v62 = vadd.f32 %v1274_v35, %v1113_v34 }
 0x23a   : > { %1749 = vtanh.f32 %v1383_v24  ;;  %v1730_v50 = vpop.eup %1729 }
 0x23b   : > { %1751 = vtanh.f32 %v1275_v62  ;;  %v1347_v8 = vmul.f32 %v1730_v50, %v1317_v37  ;;  %v1488_v37 = vmul.f32 0.5, %v1251_v44 }
 0x23c   : > { %v1732_v42 = vpop.eup %1731  ;;  %1753 = vtanh.f32 %v1384_v46 }
 0x23d   : > { %v1734_v9 = vpop.eup %1733  ;;  %v1348_v10 = vmul.f32 %v1732_v42, %v1318_v40  ;;  %1755 = vtanh.f32 %v1435_v52  ;;  %v1349_v45 = vadd.f32 %v1347_v8, %v1345_v39 }
 0x23e   : > { %v1736_v48 = vpop.eup %1735  ;;  %1757 = vtanh.f32 %v1436_v7  ;;  %v1482_v25 = vmul.f32 0.5, %v1734_v9 }
 0x23f   : > { %v1350_v58 = vadd.f32 %v1348_v10, %v1346_v43  ;;  %v1399_v41 = vmul.f32 %v1736_v48, %v2592_v13  ;;  %1759 = vtanh.f32 %v1349_v45  ;;  %1355 = vst [vmem:[#allocation5] sm:$0xff] %v1349_v45  ;;  %v1483_v13 = vadd.f32 0.5, %v1481_v57 }
 0x240   : > { %v1738_v61 = vpop.eup %1737  ;;  %v1484_v22 = vadd.f32 0.5, %v1482_v25 }
 0x241   : > { %1761 = vtanh.f32 %v1350_v58  ;;  %1356 = vst [vmem:[#allocation5 + $0x8] sm:$0xff] %v1350_v58  ;;  %v1401_v40 = vadd.f32 %v1399_v41, %v1397_v19  ;;  %v1400_v11 = vmul.f32 %v1738_v61, %v2594_v30  ;;  %v1450_v30 = vmul.f32 %v1448_v0, %v1432_v12 }
 0x242   : > { %v1740_v1 = vpop.eup %1739  ;;  %1763 = vtanh.f32 %v1487_v17  ;;  %v1501_v33 = vmul.f32 %v1499_v4, %v1483_v13  ;;  %v1502_v18 = vmul.f32 %v1500_v26, %v1484_v22 }
 0x243   : > { %v1742_v15 = vpop.eup %1741  ;;  %1765 = vtanh.f32 %v1401_v40  ;;  %1407 = vst [vmem:[#allocation5 + $0x20] sm:$0xff] %v1401_v40  ;;  %v1402_v5 = vadd.f32 %v1400_v11, %v1398_v60  ;;  %v1451_v53 = vmul.f32 %v1740_v1, %v2598_v16 }
 0x244   : > { %v1744_v24 = vpop.eup %1743  ;;  %1767 = vtanh.f32 %v1488_v37  ;;  %v1335_v54 = vmul.f32 0.5, %v1742_v15 }
 0x245   : > { %v1746_v23 = vpop.eup %1745  ;;  %1769 = vtanh.f32 %v1402_v5  ;;  %1408 = vst [vmem:[#allocation5 + $0x18] sm:$0xff] %v1402_v5  ;;  %v1453_v29 = vadd.f32 %v1451_v53, %v1449_v63  ;;  %v1452_v6 = vmul.f32 %v1744_v24, %v1422_v2 }
 0x246   : > { %v1748_v28 = vpop.eup %1747  ;;  %v1336_v55 = vmul.f32 0.5, %v1746_v23  ;;  %v1337_v50 = vadd.f32 0.5, %v1335_v54 }
 0x247   : > { %v1750_v32 = vpop.eup %1749  ;;  %1771 = vtanh.f32 %v1453_v29  ;;  %1459 = vst [vmem:[#allocation5 + $0x38] sm:$0xff] %v1453_v29  ;;  %v1454_v34 = vadd.f32 %v1452_v6, %v1450_v30  ;;  %v1503_v16 = vmul.f32 %v1748_v28, %v1473_v21 }
 0x248   : > { %v1752_v35 = vpop.eup %1751  ;;  %v1387_v38 = vmul.f32 0.5, %v1750_v32  ;;  %v1338_v39 = vadd.f32 0.5, %v1336_v55 }
 0x249   : > { %1773 = vtanh.f32 %v1454_v34  ;;  %1460 = vst [vmem:[#allocation5 + $0x30] sm:$0xff] %v1454_v34  ;;  %v1505_v46 = vadd.f32 %v1503_v16, %v1501_v33  ;;  %v1504_v62 = vmul.f32 %v1752_v35, %v1474_v59  ;;  %v1754_v49 = vpop.eup %1753 }
 0x24a   : > { %v1756_v36 = vpop.eup %1755  ;;  %v1388_v7 = vmul.f32 0.5, %v1754_v49  ;;  %v1389_v44 = vadd.f32 0.5, %v1387_v38 }
 0x24b   : > { %1775 = vtanh.f32 %v1505_v46  ;;  %1511 = vst [vmem:[#allocation5 + $0x10] sm:$0xff] %v1505_v46  ;;  %v1506_v52 = vadd.f32 %v1504_v62, %v1502_v18  ;;  %v1758_v14 = vpop.eup %1757  ;;  %v1439_v8 = vmul.f32 0.5, %v1756_v36 }
 0x24c   : > { %v1760_v31 = vpop.eup %1759  ;;  %v1390_v47 = vadd.f32 0.5, %v1388_v7  ;;  %v1440_v10 = vmul.f32 0.5, %v1758_v14 }
 0x24d   : > { %1777 = vtanh.f32 %v1506_v52  ;;  %1512 = vst [vmem:[#allocation5 + $0x28] sm:$0xff] %v1506_v52  ;;  %v1353_v43 = vmul.f32 %v1760_v31, %v1337_v50  ;;  %v1441_v17 = vadd.f32 0.5, %v1439_v8 }
 0x24e   : > { %v1762_v42 = vpop.eup %1761  ;;  %v1442_v58 = vadd.f32 0.5, %v1440_v10 }
 0x24f   : > { %v1764_v27 = vpop.eup %1763  ;;  %v1354_v9 = vmul.f32 %v1762_v42, %v1338_v39  ;;  %1357 = vst [vmem:[#allocation4 + $0x18] sm:$0xff] %v1353_v43  ;;  %1359 = vst [vmem:[%s1891_s6] sm:$0xff] %v1353_v43 }
 0x250   : > { %v1766_v19 = vpop.eup %1765  ;;  %v1491_v45 = vmul.f32 0.5, %v1764_v27 }
 0x251   : > { %v1768_v20 = vpop.eup %1767  ;;  %1358 = vst [vmem:[#allocation4 + $0x38] sm:$0xff] %v1354_v9  ;;  %1360 = vst [vmem:[%s1891_s6 + $0x8] sm:$0xff] %v1354_v9  ;;  %v1405_v48 = vmul.f32 %v1766_v19, %v1389_v44 }
 0x252   : > { %v1770_v56 = vpop.eup %1769  ;;  %v1492_v41 = vmul.f32 0.5, %v1768_v20  ;;  %v1493_v25 = vadd.f32 0.5, %v1491_v45 }
 0x253   : > { %1409 = vst [vmem:[#allocation4 + $0x28] sm:$0xff] %v1405_v48  ;;  %1411 = vst [vmem:[%s1891_s6 + $0x10] sm:$0xff] %v1405_v48  ;;  %v1406_v51 = vmul.f32 %v1770_v56, %v1390_v47 }
 0x254   : > { %v1772_v57 = vpop.eup %1771  ;;  %v1494_v40 = vadd.f32 0.5, %v1492_v41 }
 0x255   : > { %1410 = vst [vmem:[#allocation4 + $0x10] sm:$0xff] %v1406_v51  ;;  %1412 = vst [vmem:[%s1891_s6 + $0x18] sm:$0xff] %v1406_v51  ;;  %v1457_v61 = vmul.f32 %v1772_v57, %v1441_v17 }
 0x256   : > { %v1774_v60 = vpop.eup %1773 }
 0x257   : > { %1461 = vst [vmem:[#allocation4 + $0x8] sm:$0xff] %v1457_v61  ;;  %1463 = vst [vmem:[%s1891_s6 + $0x20] sm:$0xff] %v1457_v61  ;;  %v1458_v37 = vmul.f32 %v1774_v60, %v1442_v58 }
 0x258   : > { %v1776_v12 = vpop.eup %1775 }
 0x259   : > { %1462 = vst [vmem:[#allocation4 + $0x20] sm:$0xff] %v1458_v37  ;;  %1464 = vst [vmem:[%s1891_s6 + $0x28] sm:$0xff] %v1458_v37  ;;  %v1509_v11 = vmul.f32 %v1776_v12, %v1493_v25 }
 0x25a   : > { %v1778_v1 = vpop.eup %1777 }
 0x25b   : > { %1513 = vst [vmem:[#allocation4 + $0x30] sm:$0xff] %v1509_v11  ;;  %1515 = vst [vmem:[%s1891_s6 + $0x30] sm:$0xff] %v1509_v11  ;;  %v1510_v2 = vmul.f32 %v1778_v1, %v1494_v40 }
 0x25d   : > { %1514 = vst [vmem:[#allocation4] sm:$0xff] %v1510_v2  ;;  %1516 = vst [vmem:[%s1891_s6 + $0x38] sm:$0xff] %v1510_v2 }
 0x25e PF: > { %s13_s16 = sadd.s32 1, %s1817_s16   ;;  %s2638_s12 = smov %s1809_s14 }
 0x25f   : > { %p10_p8 = scmp.ge.s32.totalorder %s13_s16, 18   ;;  %s2639_s13 = smov %s1813_s15 }
 0x260   : > { %s2640_s14 = smov %s2643_s17  ;;  %s2641_s15 = smov %s2647_s18 }
 0x261   :  { %12 = sbr.rel (!%p10_p8) target bundleno = 3 (0x3), region = 73 }

</bundles_post_ra>
